<compile_context>
chip_gen: v7x
topology: tpu7x:2x2x1
jax: 0.10.0
libtpu: 0.0.40
codegen_flags: <defaults>
</compile_context>

<pallas_src>
import functools

import jax
import jax.numpy as jnp
from jax import lax
from jax.experimental import pallas as pl
from jax.experimental.pallas import tpu as pltpu


def _round_up(x, m):
    return (x + m - 1) // m * m


def _default_block_n():
    """256 on v6e (fills the 256-row MXU), 128 elsewhere (v5e MXU / v7x VMEM)."""
    try:
        kind = jax.devices()[0].device_kind.lower()
    except Exception:
        return 128
    return 256 if "v6" in kind else 128


# ----------------------------------------------------------------------------
# Fused kernel: conv3x3(pad=1) + bias + ReLU + maxpool2x2 + fc1 + ReLU + fc2
# ----------------------------------------------------------------------------
def fused_forward_kernel(x_ref, bconv_ref, cb_ref, w1_ref, b1_ref, w2_ref,
                         b2_ref, out_ref):
    """One batch tile of `bt` images.

    x_ref:     (2, 14, bt, 90) bf16  shifted padded rows, all 3 kh taps along
               the last dim: x_ref[r, h, n, kh*30 + j] = xpad[n, 2h + r + kh, j]
    bconv_ref: (90, 512) bf16        banded conv weights; row = kh*30 + j,
               col = dw*256 + w*18 + co (cols 252..255 of each half are 0)
    cb_ref:    (1, 256) f32          conv bias tiled over w (zeros in pad cols)
    w1_ref:    (3584, 256) bf16      fc1 weight, rows ordered (h, w, co) + pads
    b1_ref:    (1, 256) f32
    w2_ref:    (256, 128) bf16       fc2 weight zero-padded from 10 to 128 cols
    b2_ref:    (1, 128) f32
    out_ref:   (bt, 128) f32         logits in cols 0..9 (lane-dense store)
    """
    bt = out_ref.shape[0]

    # Matmul rows ordered (r, h, n): both vertical pool phases stacked along M.
    xm = x_ref[...].reshape(2 * 14 * bt, 90)

    # Entire conv (all taps, both pool phases) in one MXU pass.
    y = jnp.dot(xm, bconv_ref[...], preferred_element_type=jnp.float32)

    m = jnp.maximum(y[:14 * bt], y[14 * bt:])            # max-pool over rows
    m = jnp.maximum(m[:, :256], m[:, 256:])              # max-pool over cols
    feat = jnp.maximum(m + cb_ref[...], 0.0)             # bias + ReLU, (14*bt, 256)

    # Lay the 14 h-blocks side by side along lanes -> (bt, 3584) so fc1 is one
    # matmul and the (h, w, c) contraction accumulates inside the MXU.
    fc_in = jnp.concatenate(
        [feat[h * bt:(h + 1) * bt, :] for h in range(14)], axis=-1
    ).astype(jnp.bfloat16)                                # (bt, 3584)

    hidden = jnp.dot(fc_in, w1_ref[...], preferred_element_type=jnp.float32)
    hidden = jnp.maximum(hidden + b1_ref[...], 0.0).astype(jnp.bfloat16)

    # fc2 (output padded to 128 lanes so the store is unmasked / lane-dense).
    logits = jnp.dot(hidden, w2_ref[...], preferred_element_type=jnp.float32)
    out_ref[...] = logits + b2_ref[...]


# ----------------------------------------------------------------------------
# Trace-time weight repacking (constant-cost weight transforms, no O(N) work)
# ----------------------------------------------------------------------------
def _pack_weights(params):
    conv_w, conv_b, w1, b1, w2, b2 = params
    wk = conv_w.reshape(18, 3, 3).astype(jnp.float32)        # (co, kh, kw)

    # Banded conv weights: B[kh*30+j, dw*256 + w*18 + co] = wk[co, kh, j-(2w+dw)]
    j = jnp.arange(30)[:, None, None]
    dw = jnp.arange(2)[None, :, None]
    w = jnp.arange(14)[None, None, :]
    kw = j - 2 * w - dw                                      # (30, 2, 14)
    valid = ((kw >= 0) & (kw <= 2)).astype(jnp.float32)
    kw_c = jnp.clip(kw, 0, 2)
    bands = []
    for kh in range(3):
        wk_kh = wk[:, kh, :]                                 # (18, 3)
        vals = wk_kh[:, kw_c] * valid[None]                  # (18, 30, 2, 14)
        bands.append(jnp.transpose(vals, (1, 2, 3, 0)))      # (30, 2, 14, 18)
    bconv = jnp.stack(bands, axis=0).reshape(3, 30, 2, 252)
    bconv = jnp.pad(bconv, ((0, 0), (0, 0), (0, 0), (0, 4)))
    bconv = bconv.reshape(90, 512).astype(jnp.bfloat16)      # taps along K

    # Conv bias tiled over w (col = w*18 + co), zero in the 4 pad columns.
    cb = jnp.concatenate([jnp.tile(conv_b.reshape(-1).astype(jnp.float32), 14),
                          jnp.zeros((4,), jnp.float32)]).reshape(1, 256)

    # fc1: permute input rows (c, h, w) -> (h, w, c), pad 252->256 per h-block,
    # flatten to (14*256, 256) so fc1 is a single matmul against (bt, 3584).
    w1p = w1.reshape(18, 14, 14, 256).transpose(1, 2, 0, 3).reshape(14, 252, 256)
    w1p = jnp.pad(w1p, ((0, 0), (0, 4), (0, 0)))
    w1p = w1p.reshape(14 * 256, 256).astype(jnp.bfloat16)

    # fc2: pad output columns 10 -> 128 (lane-dense kernel output).
    w2p = jnp.pad(w2, ((0, 0), (0, 128 - 10))).astype(jnp.bfloat16)
    b2p = jnp.pad(b2, ((0, 0), (0, 128 - 10))).astype(jnp.float32)

    return bconv, cb, w1p, b1.astype(jnp.float32), w2p, b2p


# ----------------------------------------------------------------------------
# Wrapper
# ----------------------------------------------------------------------------
@functools.partial(jax.jit, static_argnames=("block_n",))
def forward(x, params, block_n=None):
    """x: (N, 1, 28, 28) float32 NCHW (PyTorch layout) -> logits (N, 10)."""
    if block_n is None:
        block_n = _default_block_n()
    n = x.shape[0]

    # Batch tile: always a multiple of 8 (BlockSpec (8,128) rule).
    bt = max(8, _round_up(min(block_n, _round_up(max(n, 1), 8)), 8))
    npad = _round_up(n, bt)
    # Guarantee >= 2 grid steps when the batch is big enough, so megacore
    # (v7x: 2 TensorCores) can shard the "parallel" grid axis.
    if npad // bt == 1 and npad >= 16:
        bt = _round_up(npad // 2, 8)
        npad = _round_up(n, bt)

    bconv, cb, w1p, b1, w2p, b2p = _pack_weights(params)

    # Host-side data prep only: zero-pad (3x3 conv, pad=1), then for each
    # vertical pool phase r emit the 14 even-stride row triples with all 3 kh
    # taps concatenated along the last dim (lane dim = 90, pads to 128 anyway).
    xp = jnp.pad(x[:, 0], ((0, npad - n), (1, 1), (1, 1)))    # (npad, 30, 30)
    xp = xp.astype(jnp.bfloat16)
    slabs = []
    for r in range(2):
        taps = [xp[:, r + kh:r + kh + 27:2, :] for kh in range(3)]  # (npad,14,30)
        slabs.append(jnp.concatenate(taps, axis=-1))                # (npad,14,90)
    x90 = jnp.stack(slabs, axis=0).transpose(0, 2, 1, 3)            # (2,14,npad,90)

    # Per-call cost hint so XLA schedules the surrounding pad/slice ops well.
    flops = 2 * npad * (28 * 90 * 512 + 3584 * 256 + 256 * 128)
    bytes_accessed = (2 * 14 * npad * 90 * 2          # x tile (bf16)
                      + 90 * 512 * 2 + 3584 * 256 * 2 + 256 * 128 * 2
                      + (256 + 256 + 128) * 4
                      + npad * 128 * 4)               # output (f32)
    cost = pl.CostEstimate(flops=int(flops), transcendentals=0,
                           bytes_accessed=int(bytes_accessed))

    # VMEM limit scales with the batch tile; keep <= 48 MiB for v7x (64 MiB
    # physical per TC), allow 64 MiB only for the big v6e tile.
    vmem_limit = (64 if bt > 128 else 40) * 1024 * 1024

    out = pl.pallas_call(
        fused_forward_kernel,
        out_shape=jax.ShapeDtypeStruct((npad, 128), jnp.float32),
        grid=(npad // bt,),
        in_specs=[
            pl.BlockSpec((2, 14, bt, 90), lambda i: (0, 0, i, 0)),
            pl.BlockSpec((90, 512), lambda i: (0, 0)),
            pl.BlockSpec((1, 256), lambda i: (0, 0)),
            pl.BlockSpec((14 * 256, 256), lambda i: (0, 0)),
            pl.BlockSpec((1, 256), lambda i: (0, 0)),
            pl.BlockSpec((256, 128), lambda i: (0, 0)),
            pl.BlockSpec((1, 128), lambda i: (0, 0)),
        ],
        out_specs=pl.BlockSpec((bt, 128), lambda i: (i, 0)),
        compiler_params=pltpu.CompilerParams(
            dimension_semantics=("parallel",),
            vmem_limit_bytes=vmem_limit,
        ),
        cost_estimate=cost,
    )(x90, bconv, cb, w1p, b1, w2p, b2p)
    return out[:n, :10]


# ----------------------------------------------------------------------------
# Deterministic parameter init (same shapes as the PyTorch module)
# ----------------------------------------------------------------------------
def init_params(key):
    ks = jax.random.split(key, 6)

    def u(k, shape, fan_in):
        bound = 1.0 / jnp.sqrt(fan_in)
        return jax.random.uniform(k, shape, jnp.float32, -bound, bound)

    conv_w = u(ks[0], (18, 1, 3, 3), 9)                      # Conv2d(1, 18, 3)
    conv_b = u(ks[1], (1, 18), 9)
    w1 = u(ks[2], (18 * 14 * 14, 256), 18 * 14 * 14)         # Linear stored (in, out)
    b1 = u(ks[3], (1, 256), 18 * 14 * 14)
    w2 = u(ks[4], (256, 10), 256)
    b2 = u(ks[5], (1, 10), 256)
    return conv_w, conv_b, w1, b1, w2, b2


# ----------------------------------------------------------------------------
# Pure-JAX f32 reference (correctness check only)
# ----------------------------------------------------------------------------
def reference_forward(x, params):
    conv_w, conv_b, w1, b1, w2, b2 = params
    y = lax.conv_general_dilated(
        x, conv_w, window_strides=(1, 1), padding=((1, 1), (1, 1)),
        dimension_numbers=("NCHW", "OIHW", "NCHW"),
        precision=lax.Precision.HIGHEST,
    ) + conv_b.reshape(1, 18, 1, 1)
    y = jnp.maximum(y, 0.0)
    y = lax.reduce_window(y, -jnp.inf, lax.max, (1, 1, 2, 2), (1, 1, 2, 2), "VALID")
    f = y.reshape(x.shape[0], -1)
    h = jnp.maximum(f @ w1 + b1, 0.0)
    return h @ w2 + b2


# ----------------------------------------------------------------------------
if __name__ == "__main__":
    key = jax.random.PRNGKey(0)
    pkey, k1, k2, k3 = jax.random.split(key, 4)
    params = init_params(pkey)

    # Shapes implied by the module: 1 channel, 28x28 (18*14*14 flatten).
    x = jax.random.normal(k1, (2, 1, 28, 28), dtype=jnp.float32)
    logits = forward(x, params)
    jax.block_until_ready(logits)
    ref = reference_forward(x, params)
    assert logits.shape == (2, 10)
    assert jnp.allclose(logits, ref, atol=5e-2, rtol=5e-2)

    # Multi-tile grid (3 batch tiles of 8).
    x2 = jax.random.normal(k2, (20, 1, 28, 28), dtype=jnp.float32)
    logits2 = forward(x2, params, block_n=8)
    jax.block_until_ready(logits2)
    ref2 = reference_forward(x2, params)
    assert logits2.shape == (20, 10)
    assert jnp.allclose(logits2, ref2, atol=5e-2, rtol=5e-2)

    # Default tile with the >=2-grid-step split path (megacore) + batch padding.
    x3 = jax.random.normal(k3, (40, 1, 28, 28), dtype=jnp.float32)
    logits3 = forward(x3, params)
    jax.block_until_ready(logits3)
    ref3 = reference_forward(x3, params)
    assert logits3.shape == (40, 10)
    assert jnp.allclose(logits3, ref3, atol=5e-2, rtol=5e-2)

    print("KERNEL_OK")
</pallas_src>

<mosaic_0001>
module attributes {stable_mosaic.version = 11 : i64} {
  func.func @fused_forward_kernel(%arg0: i32, %arg1: memref<2x14x8x90xbf16, #tpu.memory_space<vmem>>, %arg2: memref<90x512xbf16, #tpu.memory_space<vmem>>, %arg3: memref<1x256xf32, #tpu.memory_space<vmem>>, %arg4: memref<3584x256xbf16, #tpu.memory_space<vmem>>, %arg5: memref<1x256xf32, #tpu.memory_space<vmem>>, %arg6: memref<256x128xbf16, #tpu.memory_space<vmem>>, %arg7: memref<1x128xf32, #tpu.memory_space<vmem>>, %arg8: memref<8x128xf32, #tpu.memory_space<vmem>>) attributes {dimension_semantics = [#tpu.dimension_semantics<parallel>], iteration_bounds = array<i64: 1>, scalar_prefetch = 0 : i64, scratch_operands = 0 : i64, tpu.core_type = #tpu.core_type<tc>, window_params = [{transform_indices = @transform_0, window_bounds = array<i64: 2, 14, 8, 90>}, {pipeline_mode = #tpu.pipeline_mode<synchronous>, transform_indices = @transform_1, window_bounds = array<i64: 90, 512>}, {pipeline_mode = #tpu.pipeline_mode<synchronous>, transform_indices = @transform_2, window_bounds = array<i64: 1, 256>}, {pipeline_mode = #tpu.pipeline_mode<synchronous>, transform_indices = @transform_3, window_bounds = array<i64: 3584, 256>}, {pipeline_mode = #tpu.pipeline_mode<synchronous>, transform_indices = @transform_4, window_bounds = array<i64: 1, 256>}, {pipeline_mode = #tpu.pipeline_mode<synchronous>, transform_indices = @transform_5, window_bounds = array<i64: 256, 128>}, {pipeline_mode = #tpu.pipeline_mode<synchronous>, transform_indices = @transform_6, window_bounds = array<i64: 1, 128>}, {transform_indices = @transform_7, window_bounds = array<i64: 8, 128>}]} {
    %c0 = arith.constant 0 : index
    %c0_0 = arith.constant 0 : index
    %c0_1 = arith.constant 0 : index
    %c0_2 = arith.constant 0 : index
    %0 = vector.load %arg1[%c0, %c0_0, %c0_1, %c0_2] : memref<2x14x8x90xbf16, #tpu.memory_space<vmem>>, vector<2x14x8x90xbf16>
    %1 = vector.shape_cast %0 : vector<2x14x8x90xbf16> to vector<224x90xbf16>
    %c0_3 = arith.constant 0 : index
    %c0_4 = arith.constant 0 : index
    %2 = vector.load %arg2[%c0_3, %c0_4] : memref<90x512xbf16, #tpu.memory_space<vmem>>, vector<90x512xbf16>
    %cst = arith.constant dense<0.000000e+00> : vector<224x512xf32>
    %3 = tpu.matmul %1, %2, %cst {dimension_numbers = #tpu.dot_dimension_numbers<[1], [0], [0], [1], [0, 0, 1, 1], [], []>} : vector<224x90xbf16>, vector<90x512xbf16>, vector<224x512xf32> -> vector<224x512xf32>
    %4 = vector.extract_strided_slice %3 {offsets = [0, 0], sizes = [112, 512], strides = [1, 1]} : vector<224x512xf32> to vector<112x512xf32>
    %5 = vector.extract_strided_slice %3 {offsets = [112, 0], sizes = [112, 512], strides = [1, 1]} : vector<224x512xf32> to vector<112x512xf32>
    %6 = arith.maximumf %4, %5 : vector<112x512xf32>
    %7 = vector.extract_strided_slice %6 {offsets = [0, 0], sizes = [112, 256], strides = [1, 1]} : vector<112x512xf32> to vector<112x256xf32>
    %8 = vector.extract_strided_slice %6 {offsets = [0, 256], sizes = [112, 256], strides = [1, 1]} : vector<112x512xf32> to vector<112x256xf32>
    %9 = arith.maximumf %7, %8 : vector<112x256xf32>
    %c0_5 = arith.constant 0 : index
    %c0_6 = arith.constant 0 : index
    %10 = vector.load %arg3[%c0_5, %c0_6] : memref<1x256xf32, #tpu.memory_space<vmem>>, vector<1x256xf32>
    %11 = vector.broadcast %10 : vector<1x256xf32> to vector<112x256xf32>
    %12 = arith.addf %9, %11 : vector<112x256xf32>
    %cst_7 = arith.constant 0.000000e+00 : f32
    %13 = vector.broadcast %cst_7 : f32 to vector<112x256xf32>
    %14 = arith.maximumf %12, %13 : vector<112x256xf32>
    %15 = vector.extract_strided_slice %14 {offsets = [0, 0], sizes = [8, 256], strides = [1, 1]} : vector<112x256xf32> to vector<8x256xf32>
    %16 = vector.extract_strided_slice %14 {offsets = [8, 0], sizes = [8, 256], strides = [1, 1]} : vector<112x256xf32> to vector<8x256xf32>
    %17 = vector.extract_strided_slice %14 {offsets = [16, 0], sizes = [8, 256], strides = [1, 1]} : vector<112x256xf32> to vector<8x256xf32>
    %18 = vector.extract_strided_slice %14 {offsets = [24, 0], sizes = [8, 256], strides = [1, 1]} : vector<112x256xf32> to vector<8x256xf32>
    %19 = vector.extract_strided_slice %14 {offsets = [32, 0], sizes = [8, 256], strides = [1, 1]} : vector<112x256xf32> to vector<8x256xf32>
    %20 = vector.extract_strided_slice %14 {offsets = [40, 0], sizes = [8, 256], strides = [1, 1]} : vector<112x256xf32> to vector<8x256xf32>
    %21 = vector.extract_strided_slice %14 {offsets = [48, 0], sizes = [8, 256], strides = [1, 1]} : vector<112x256xf32> to vector<8x256xf32>
    %22 = vector.extract_strided_slice %14 {offsets = [56, 0], sizes = [8, 256], strides = [1, 1]} : vector<112x256xf32> to vector<8x256xf32>
    %23 = vector.extract_strided_slice %14 {offsets = [64, 0], sizes = [8, 256], strides = [1, 1]} : vector<112x256xf32> to vector<8x256xf32>
    %24 = vector.extract_strided_slice %14 {offsets = [72, 0], sizes = [8, 256], strides = [1, 1]} : vector<112x256xf32> to vector<8x256xf32>
    %25 = vector.extract_strided_slice %14 {offsets = [80, 0], sizes = [8, 256], strides = [1, 1]} : vector<112x256xf32> to vector<8x256xf32>
    %26 = vector.extract_strided_slice %14 {offsets = [88, 0], sizes = [8, 256], strides = [1, 1]} : vector<112x256xf32> to vector<8x256xf32>
    %27 = vector.extract_strided_slice %14 {offsets = [96, 0], sizes = [8, 256], strides = [1, 1]} : vector<112x256xf32> to vector<8x256xf32>
    %28 = vector.extract_strided_slice %14 {offsets = [104, 0], sizes = [8, 256], strides = [1, 1]} : vector<112x256xf32> to vector<8x256xf32>
    %29 = tpu.concatenate %15, %16, %17, %18, %19, %20, %21, %22, %23, %24, %25, %26, %27, %28 in 1 : vector<8x256xf32>, vector<8x256xf32>, vector<8x256xf32>, vector<8x256xf32>, vector<8x256xf32>, vector<8x256xf32>, vector<8x256xf32>, vector<8x256xf32>, vector<8x256xf32>, vector<8x256xf32>, vector<8x256xf32>, vector<8x256xf32>, vector<8x256xf32>, vector<8x256xf32> -> vector<8x3584xf32>
    %30 = arith.truncf %29 : vector<8x3584xf32> to vector<8x3584xbf16>
    %c0_8 = arith.constant 0 : index
    %c0_9 = arith.constant 0 : index
    %31 = vector.load %arg4[%c0_8, %c0_9] : memref<3584x256xbf16, #tpu.memory_space<vmem>>, vector<3584x256xbf16>
    %cst_10 = arith.constant dense<0.000000e+00> : vector<8x256xf32>
    %32 = tpu.matmul %30, %31, %cst_10 {dimension_numbers = #tpu.dot_dimension_numbers<[1], [0], [0], [1], [0, 0, 1, 1], [], []>} : vector<8x3584xbf16>, vector<3584x256xbf16>, vector<8x256xf32> -> vector<8x256xf32>
    %c0_11 = arith.constant 0 : index
    %c0_12 = arith.constant 0 : index
    %33 = vector.load %arg5[%c0_11, %c0_12] : memref<1x256xf32, #tpu.memory_space<vmem>>, vector<1x256xf32>
    %34 = vector.broadcast %33 : vector<1x256xf32> to vector<8x256xf32>
    %35 = arith.addf %32, %34 : vector<8x256xf32>
    %cst_13 = arith.constant 0.000000e+00 : f32
    %36 = vector.broadcast %cst_13 : f32 to vector<8x256xf32>
    %37 = arith.maximumf %35, %36 : vector<8x256xf32>
    %38 = arith.truncf %37 : vector<8x256xf32> to vector<8x256xbf16>
    %c0_14 = arith.constant 0 : index
    %c0_15 = arith.constant 0 : index
    %39 = vector.load %arg6[%c0_14, %c0_15] : memref<256x128xbf16, #tpu.memory_space<vmem>>, vector<256x128xbf16>
    %cst_16 = arith.constant dense<0.000000e+00> : vector<8x128xf32>
    %40 = tpu.matmul %38, %39, %cst_16 {dimension_numbers = #tpu.dot_dimension_numbers<[1], [0], [0], [1], [0, 0, 1, 1], [], []>} : vector<8x256xbf16>, vector<256x128xbf16>, vector<8x128xf32> -> vector<8x128xf32>
    %c0_17 = arith.constant 0 : index
    %c0_18 = arith.constant 0 : index
    %41 = vector.load %arg7[%c0_17, %c0_18] : memref<1x128xf32, #tpu.memory_space<vmem>>, vector<1x128xf32>
    %42 = vector.broadcast %41 : vector<1x128xf32> to vector<8x128xf32>
    %43 = arith.addf %40, %42 : vector<8x128xf32>
    %c0_19 = arith.constant 0 : index
    %c0_20 = arith.constant 0 : index
    %44 = vector.load %arg8[%c0_19, %c0_20] : memref<8x128xf32, #tpu.memory_space<vmem>>, vector<8x128xf32>
    tpu.vector_store %arg8[%c0_19, %c0_20], %43 {strides = array<i32>} : memref<8x128xf32, #tpu.memory_space<vmem>>, vector<8x128xf32>,
    return
  }
  func.func @transform_0(%arg0: i32) -> (i32, i32, i32, i32) {
    %c0_i32 = arith.constant 0 : i32
    %c0_i32_0 = arith.constant 0 : i32
    %c0_i32_1 = arith.constant 0 : i32
    %c0_i32_2 = arith.constant 0 : i32
    return %c0_i32, %c0_i32_0, %arg0, %c0_i32_1 : i32, i32, i32, i32
  }
  func.func @transform_1(%arg0: i32) -> (i32, i32) {
    %c0_i32 = arith.constant 0 : i32
    %c0_i32_0 = arith.constant 0 : i32
    %c0_i32_1 = arith.constant 0 : i32
    return %c0_i32, %c0_i32_0 : i32, i32
  }
  func.func @transform_2(%arg0: i32) -> (i32, i32) {
    %c0_i32 = arith.constant 0 : i32
    %c0_i32_0 = arith.constant 0 : i32
    %c0_i32_1 = arith.constant 0 : i32
    return %c0_i32, %c0_i32_0 : i32, i32
  }
  func.func @transform_3(%arg0: i32) -> (i32, i32) {
    %c0_i32 = arith.constant 0 : i32
    %c0_i32_0 = arith.constant 0 : i32
    %c0_i32_1 = arith.constant 0 : i32
    return %c0_i32, %c0_i32_0 : i32, i32
  }
  func.func @transform_4(%arg0: i32) -> (i32, i32) {
    %c0_i32 = arith.constant 0 : i32
    %c0_i32_0 = arith.constant 0 : i32
    %c0_i32_1 = arith.constant 0 : i32
    return %c0_i32, %c0_i32_0 : i32, i32
  }
  func.func @transform_5(%arg0: i32) -> (i32, i32) {
    %c0_i32 = arith.constant 0 : i32
    %c0_i32_0 = arith.constant 0 : i32
    %c0_i32_1 = arith.constant 0 : i32
    return %c0_i32, %c0_i32_0 : i32, i32
  }
  func.func @transform_6(%arg0: i32) -> (i32, i32) {
    %c0_i32 = arith.constant 0 : i32
    %c0_i32_0 = arith.constant 0 : i32
    %c0_i32_1 = arith.constant 0 : i32
    return %c0_i32, %c0_i32_0 : i32, i32
  }
  func.func @transform_7(%arg0: i32) -> (i32, i32) {
    %c0_i32 = arith.constant 0 : i32
    %c0_i32_0 = arith.constant 0 : i32
    return %arg0, %c0_i32 : i32, i32
  }
}

</mosaic_0001>

<bundles_post_ra>
// kernel: tile.6
= control target key start
LH: loop header
LB: loop body
LE: loop exit
PB: predicated region body
PF: predicated region fallthrough
CT: control target
= control target key end

     0   :  { %s28_s0 = inlined_call_operand.vmem [shape: f32[18], index: 0, kind: input, shape index: {}]   ;;  %s29_s1 = inlined_call_operand.vmem [shape: f32[14,18], index: 1, kind: output, shape index: {}]  }
   0x1   :  { %v4_v0 = vld [vmem:[%s28_s0] ss:$0 sm:$0xff] }
   0x2   :  { %5 = vst [vmem:[%s29_s1] sm:$0xff] %v4_v0  ;;  %8 = vst [vmem:[%s29_s1 + $0x8] sm:$0xff] %v4_v0 }

// kernel: tile.7
= control target key start
LH: loop header
LB: loop body
LE: loop exit
PB: predicated region body
PF: predicated region fallthrough
CT: control target
= control target key end

     0   :  { %vm9_vm0 = vcmask 15360   ;;  %s129_s12 = smov 126   ;;  %s130_s13 = smov 106   ;;  %vm3_vm1 = vcmask 146432   ;;  %vm13_vm2 = vcmask 130048   ;;  %vm16_vm3 = vcmask 1048560   ;;  %s200_s0 = inlined_call_operand.vmem [shape: f32[14,18], index: 0, kind: input, shape index: {}]   ;;  %s201_s1 = inlined_call_operand.vmem [shape: f32[252], index: 1, kind: output, shape index: {}]  }
   0x1   :  { %v102_v0 = vld [vmem:[%s200_s0 + $0x7] sm:$0x1]   ;;  %v105_v3 = vld [vmem:[%s200_s0 + $0xd] sm:$0x1]   ;;  %v104_v4 = vld [vmem:[%s200_s0 + $0x6] sm:$0x1]  }
   0x2   :  { %v103_v1 = vld [vmem:[%s200_s0 + $0x7] sm:$0x1]   ;;  %26 = vrot.lane.b32.xlu1 %v105_v3, %s130_s13  ;;  %v106_v5 = vld [vmem:[%s200_s0 + $0x5] sm:$0x1]   ;;  %s131_s18 = smov 108   ;;  %s132_s19 = smov 90  }
   0x3   :  { %v10_v2 = vsel %vm9_vm0, %v103_v1, %v102_v0  ;;  %v107_v6 = vld [vmem:[%s200_s0 + $0xc] sm:$0x1]   ;;  %v108_v7 = vld [vmem:[%s200_s0 + $0x4] sm:$0x1]   ;;  %v2_v8 = vld [vmem:[%s200_s0] sm:$0x1]  }
   0x4   :  { %11 = vrot.lane.b32.xlu0 %v10_v2, %s129_s12  ;;  %4 = vst.msk [vmem:[#allocation0] sm:$0x1] %vm3_vm1, %v2_v8   ;;  %s133_s26 = smov 88   ;;  %s134_s27 = smov 72   ;;  %v109_v9 = vld [vmem:[%s200_s0 + $0xb] sm:$0x1]  }
   0x5   :  { %v110_v10 = vld [vmem:[%s200_s0 + $0x3] sm:$0x1]   ;;  %s135_s3 = smov 70   ;;  %s136_s4 = smov 54   ;;  %v111_v11 = vld [vmem:[%s200_s0 + $0xa] sm:$0x1]  }
   0x6   :  { %33 = vrot.lane.b32.xlu1 %v106_v5, %s132_s19  ;;  %v112_v12 = vld [vmem:[%s200_s0 + $0x2] sm:$0x1]   ;;  %s137_s9 = smov 52   ;;  %s138_s10 = smov 36   ;;  %v113_v13 = vld [vmem:[%s200_s0 + $0x9] sm:$0x1]  }
   0x7   :  { %v114_v14 = vld [vmem:[%s200_s0 + $0x1] sm:$0x1]   ;;  %s139_s15 = smov 34   ;;  %s140_s16 = smov 18   ;;  %v115_v15 = vld [vmem:[%s200_s0 + $0x8] sm:$0x1]  }
   0x8   :  { %20 = vrot.lane.b32.xlu0 %v104_v4, %s131_s18  ;;  %s141_s0 = smov 16   ;;  %vm28_vm4 = vcmask 1015632   ;;  %vm22_vm5 = vcmask 1032032   ;;  %vm35_vm6 = vcmask 884432   ;;  %vm41_vm7 = vcmask 868032  }
   0x9   :  { %vm48_vm8 = vcmask 736832   ;;  %vm54_vm9 = vcmask 720432   ;;  %vm61_vm10 = vcmask 589232   ;;  %vm67_vm11 = vcmask 572832  }
   0xa   :  { %46 = vrot.lane.b32.xlu1 %v108_v7, %s134_s27  ;;  %vm74_vm12 = vcmask 441632   ;;  %vm80_vm13 = vcmask 425232   ;;  %vm87_vm14 = vcmask 294032   ;;  %vm93_vm15 = vcmask 277632  }
   0xc   :  { %39 = vrot.lane.b32.xlu0 %v107_v6, %s133_s26 }
   0xe   :  { %59 = vrot.lane.b32.xlu1 %v110_v10, %s136_s4 }
  0x10   :  { %52 = vrot.lane.b32.xlu0 %v109_v9, %s135_s3 }
  0x12   :  { %72 = vrot.lane.b32.xlu1 %v112_v12, %s138_s10 }
  0x14   :  { %65 = vrot.lane.b32.xlu0 %v111_v11, %s137_s9 }
  0x16   :  { %85 = vrot.lane.b32.xlu1 %v114_v14, %s140_s16 }
  0x18   :  { %78 = vrot.lane.b32.xlu0 %v113_v13, %s139_s15 }
  0x1c   :  { %91 = vrot.lane.b32.xlu0 %v115_v15, %s141_s0 }
  0x74   :  { %v27_v17 = vpop.permute.xlu1 %26  }
  0x76   :  { %v12_v16 = vpop.permute.xlu0 %11  }
  0x77   :  { %15 = vst.msk [vmem:[#allocation0 + $0x1] sm:$0x1] %vm13_vm2, %v12_v16  }
  0x78   :  { %17 = vst.msk [vmem:[#allocation0] sm:$0x1] %vm16_vm3, %v12_v16   ;;  %v34_v19 = vpop.permute.xlu1 %33  }
  0x79   :  { %30 = vst.msk [vmem:[#allocation0 + $0x1] sm:$0x1] %vm28_vm4, %v27_v17  }
  0x7a   :  { %v21_v18 = vpop.permute.xlu0 %20  }
  0x7b   :  { %23 = vst.msk [vmem:[#allocation0] sm:$0x1] %vm22_vm5, %v21_v18  }
  0x7c   :  { %36 = vst.msk [vmem:[#allocation0] sm:$0x1] %vm35_vm6, %v34_v19   ;;  %v47_v21 = vpop.permute.xlu1 %46  }
  0x7d   :  { %49 = vst.msk [vmem:[#allocation0] sm:$0x1] %vm48_vm8, %v47_v21  }
  0x7e   :  { %v40_v20 = vpop.permute.xlu0 %39  }
  0x7f   :  { %43 = vst.msk [vmem:[#allocation0 + $0x1] sm:$0x1] %vm41_vm7, %v40_v20  }
  0x80   :  { %v60_v23 = vpop.permute.xlu1 %59  }
  0x81   :  { %62 = vst.msk [vmem:[#allocation0] sm:$0x1] %vm61_vm10, %v60_v23  }
  0x82   :  { %v53_v22 = vpop.permute.xlu0 %52  }
  0x83   :  { %56 = vst.msk [vmem:[#allocation0 + $0x1] sm:$0x1] %vm54_vm9, %v53_v22  }
  0x84   :  { %v73_v25 = vpop.permute.xlu1 %72  }
  0x85   :  { %75 = vst.msk [vmem:[#allocation0] sm:$0x1] %vm74_vm12, %v73_v25  }
  0x86   :  { %v66_v24 = vpop.permute.xlu0 %65  }
  0x87   :  { %69 = vst.msk [vmem:[#allocation0 + $0x1] sm:$0x1] %vm67_vm11, %v66_v24  }
  0x88   :  { %v86_v27 = vpop.permute.xlu1 %85  }
  0x89   :  { %88 = vst.msk [vmem:[#allocation0] sm:$0x1] %vm87_vm14, %v86_v27  }
  0x8a   :  { %v79_v26 = vpop.permute.xlu0 %78  }
  0x8b   :  { %82 = vst.msk [vmem:[#allocation0 + $0x1] sm:$0x1] %vm80_vm13, %v79_v26  }
  0x8e   :  { %v92_v28 = vpop.permute.xlu0 %91  }
  0x8f   :  { %95 = vst.msk [vmem:[#allocation0 + $0x1] sm:$0x1] %vm93_vm15, %v92_v28  }
  0x96   :  { %v99_v29 = vld [vmem:[#allocation0] sm:$0x3] }
  0x97   :  { %101 = vst [vmem:[%s201_s1] sm:$0x3] %v99_v29 }

// kernel: forward.1
= control target key start
LH: loop header
LB: loop body
LE: loop exit
PB: predicated region body
PF: predicated region fallthrough
CT: control target
= control target key end

     0   :  { %v5651_v1 = vmov 0   ;;  %vm308_vm0 = vcmask 1044480   ;;  %vm265_vm1 = vcmask 736256   ;;  %s7711_s1 = inlined_call_operand.vmem [shape: bf16[90,512], index: 1, kind: input, shape index: {}]   ;;  %s7712_s0 = inlined_call_operand.vmem [shape: bf16[2,14,8,90], index: 0, kind: input, shape index: {}]   ;;  %s7713_s3 = inlined_call_operand.vmem [shape: bf16[3584,256], index: 3, kind: input, shape index: {}]   ;;  %s7714_s2 = inlined_call_operand.vmem [shape: f32[1,256], index: 2, kind: input, shape index: {}]   ;;  %s7715_s5 = inlined_call_operand.vmem [shape: bf16[256,128], index: 5, kind: input, shape index: {}]   ;;  %s7716_s4 = inlined_call_operand.vmem [shape: f32[1,256], index: 4, kind: input, shape index: {}]   ;;  %s7717_s6 = inlined_call_operand.vmem [shape: f32[1,128], index: 6, kind: input, shape index: {}]   ;;  %s7718_s7 = inlined_call_operand.vmem [shape: f32[8,128], index: 7, kind: output, shape index: {}]  }
   0x1   :  { %v4913_v0 = vld [vmem:[%s7711_s1 + $0x4] ss:$16 sps:$4 sm:$0xff]   ;;  %353 = vmatprep.mubr.bf16.mxu1 %v5651_v1  ;;  %v4915_v2 = vld [vmem:[%s7711_s1] ss:$16 sps:$4 sm:$0xff]   ;;  %v4934_v14 = vld [vmem:[%s7711_s1 + $0xc] ss:$16 sps:$4 sm:$0xff]  }
   0x2   :  { %321 = vmatprep.subr.bf16.mxu1 %v4913_v0  ;;  %v4916_v3 = vld [vmem:[%s7711_s1 + $0x24] ss:$16 sps:$4 sm:$0xff]   ;;  %v4918_v4 = vld [vmem:[%s7711_s1 + $0x20] ss:$16 sps:$4 sm:$0xff]   ;;  %v4932_v16 = vld [vmem:[%s7711_s1 + $0x8] ss:$16 sps:$4 sm:$0xff]  }
   0x3   :  { %322 = vmatpush1.bf16.msra.mxu1 %v4915_v2  ;;  %v4919_v5 = vld [vmem:[%s7711_s1 + $0x44] ss:$16 sps:$4 sm:$0xff]   ;;  %v4921_v6 = vld [vmem:[%s7711_s1 + $0x40] ss:$16 sps:$4 sm:$0xff]   ;;  %v4939_v17 = vld [vmem:[%s7711_s1 + $0x2c] ss:$16 sps:$4 sm:$0xff]  }
   0x4   :  { %323 = vmatprep.subr.bf16.mxu1 %v4916_v3  ;;  %v4922_v7 = vld [vmem:[%s7711_s1 + $0x64] ss:$16 sps:$4 sm:$0xff]   ;;  %v4924_v8 = vld [vmem:[%s7711_s1 + $0x60] ss:$16 sps:$4 sm:$0xff]   ;;  %v4937_v18 = vld [vmem:[%s7711_s1 + $0x28] ss:$16 sps:$4 sm:$0xff]  }
   0x5   :  { %v4925_v9 = vld [vmem:[%s7711_s1 + $0x84] ss:$16 sps:$4 sm:$0xff]   ;;  %v4927_v10 = vld [vmem:[%s7711_s1 + $0x80] ss:$16 sps:$4 sm:$0xff]   ;;  %v4944_v19 = vld [vmem:[%s7711_s1 + $0x4c] ss:$16 sps:$4 sm:$0xff]  }
   0x6   :  { %v4928_v11 = vld [vmem:[%s7711_s1 + $0xa4] ss:$16 sps:$4 sm:$0x1f]   ;;  %v4930_v12 = vld [vmem:[%s7711_s1 + $0xa0] ss:$16 sps:$4 sm:$0x1f]  }
   0x7   :  { %324 = vmatpush1.bf16.msra.mxu1 %v4918_v4  ;;  %v310_v13 = vsel %vm308_vm0, %v4930_v12, 0  ;;  %v5737_v15 = vld [vmem:[%s7712_s0] sm:$0xff]   ;;  %v4935_v20 = vld [vmem:[%s7712_s0 + $0x8] sm:$0xff]   ;;  %v4936_v25 = vld [vmem:[%s7712_s0 + $0x10] sm:$0xff]  }
   0x8   :  { %325 = vmatprep.subr.bf16.mxu1 %v4919_v5  ;;  %v4942_v21 = vld [vmem:[%s7711_s1 + $0x48] ss:$16 sps:$4 sm:$0xff]   ;;  %v4950_v22 = vld [vmem:[%s7711_s1 + $0x6c] ss:$16 sps:$4 sm:$0xff]   ;;  %v4941_v31 = vld [vmem:[%s7712_s0 + $0x20] sm:$0xff]  }
   0x9   :  { %v4948_v23 = vld [vmem:[%s7711_s1 + $0x68] ss:$16 sps:$4 sm:$0xff]   ;;  %v4955_v24 = vld [vmem:[%s7711_s1 + $0x8c] ss:$16 sps:$4 sm:$0xff]   ;;  %v4946_v33 = vld [vmem:[%s7712_s0 + $0x30] sm:$0xff]  }
   0xa   :  { %v4953_v26 = vld [vmem:[%s7711_s1 + $0x88] ss:$16 sps:$4 sm:$0xff]   ;;  %v4958_v27 = vld [vmem:[%s7711_s1 + $0xac] ss:$16 sps:$4 sm:$0x1f]   ;;  %v4951_v35 = vld [vmem:[%s7712_s0 + $0x40] sm:$0xff]  }
   0xb   :  { %326 = vmatpush1.bf16.msra.mxu1 %v4921_v6  ;;  %v4960_v28 = vld [vmem:[%s7711_s1 + $0xa8] ss:$16 sps:$4 sm:$0x1f]   ;;  %v4956_v37 = vld [vmem:[%s7712_s0 + $0x50] sm:$0xff]   ;;  %v4961_v39 = vld [vmem:[%s7712_s0 + $0x60] sm:$0xff]  }
   0xc   :  { %327 = vmatprep.subr.bf16.mxu1 %v4922_v7  ;;  %v316_v29 = vsel %vm308_vm0, %v4960_v28, 0  ;;  %v4940_v30 = vld [vmem:[%s7712_s0 + $0x18] sm:$0xff]   ;;  %v4945_v32 = vld [vmem:[%s7712_s0 + $0x28] sm:$0xff]  }
   0xd   :  { %v4947_v34 = vld [vmem:[%s7712_s0 + $0x38] sm:$0xff]   ;;  %v4952_v36 = vld [vmem:[%s7712_s0 + $0x48] sm:$0xff]  }
   0xe   :  { %v4957_v38 = vld [vmem:[%s7712_s0 + $0x58] sm:$0xff]   ;;  %v4962_v40 = vld [vmem:[%s7712_s0 + $0x68] sm:$0xff]  }
   0xf   :  { %328 = vmatpush1.bf16.msra.mxu1 %v4924_v8  ;;  %v4965_v41 = vld [vmem:[%s7713_s3 + $0x4] ss:$8 sps:$4 sm:$0xff]   ;;  %v4963_v42 = vld [vmem:[%s7713_s3] ss:$8 sps:$4 sm:$0xff]   ;;  %v4968_v43 = vld [vmem:[%s7713_s3 + $0x14] ss:$8 sps:$4 sm:$0xff]  }
  0x10   :  { %329 = vmatprep.subr.bf16.mxu1 %v4925_v9  ;;  %v4966_v44 = vld [vmem:[%s7713_s3 + $0x10] ss:$8 sps:$4 sm:$0xff]   ;;  %v4971_v45 = vld [vmem:[%s7713_s3 + $0x24] ss:$8 sps:$4 sm:$0xff]   ;;  %v4969_v46 = vld [vmem:[%s7713_s3 + $0x20] ss:$8 sps:$4 sm:$0xff]  }
  0x11   :  { %v4974_v47 = vld [vmem:[%s7713_s3 + $0x34] ss:$8 sps:$4 sm:$0xff]   ;;  %v4972_v48 = vld [vmem:[%s7713_s3 + $0x30] ss:$8 sps:$4 sm:$0xff]   ;;  %v4977_v52 = vld [vmem:[%s7713_s3 + $0x44] ss:$8 sps:$4 sm:$0xff]  }
  0x12   :  { %v4975_v54 = vld [vmem:[%s7713_s3 + $0x40] ss:$8 sps:$4 sm:$0xff]   ;;  %v4978_v55 = vld [vmem:[%s7713_s3 + $0x504] ss:$8 sps:$4 sm:$0xff]   ;;  %v4983_v57 = vld [vmem:[%s7713_s3 + $0x54] ss:$8 sps:$4 sm:$0xff]  }
  0x13   :  { %330 = vmatpush1.bf16.msra.mxu1 %v4927_v10  ;;  %v4980_v56 = vld [vmem:[%s7713_s3 + $0x500] ss:$8 sps:$4 sm:$0xff]   ;;  %3752 = vmatprep.subr.bf16.mxu0 %v4978_v55  ;;  %v4981_v58 = vld [vmem:[%s7713_s3 + $0x50] ss:$8 sps:$4 sm:$0xff]   ;;  %v4984_v60 = vld [vmem:[%s7713_s3 + $0x514] ss:$8 sps:$4 sm:$0xff]  }
  0x14   :  { %4343 = vmatprep.subr.msk.bf16.mxu1 %vm308_vm0, %v4928_v11  ;;  %3753 = vmatpush1.bf16.msra.mxu0 %v4980_v56  ;;  %v4986_v62 = vld [vmem:[%s7713_s3 + $0x510] ss:$8 sps:$4 sm:$0xff]   ;;  %v4989_v0 = vld [vmem:[%s7713_s3 + $0x64] ss:$8 sps:$4 sm:$0xff]   ;;  %v4987_v2 = vld [vmem:[%s7713_s3 + $0x60] ss:$8 sps:$4 sm:$0xff]  }
  0x15   :  { %3754 = vmatprep.subr.bf16.mxu0 %v4984_v60  ;;  %v4990_v3 = vld [vmem:[%s7713_s3 + $0x524] ss:$8 sps:$4 sm:$0xff]   ;;  %v4992_v4 = vld [vmem:[%s7713_s3 + $0x520] ss:$8 sps:$4 sm:$0xff]   ;;  %v4995_v5 = vld [vmem:[%s7713_s3 + $0x74] ss:$8 sps:$4 sm:$0xff]  }
  0x16   :  { %v4993_v6 = vld [vmem:[%s7713_s3 + $0x70] ss:$8 sps:$4 sm:$0xff]   ;;  %v4996_v8 = vld [vmem:[%s7713_s3 + $0x534] ss:$8 sps:$4 sm:$0xff]   ;;  %v5001_v12 = vld [vmem:[%s7713_s3 + $0x84] ss:$8 sps:$4 sm:$0xff]  }
  0x17   :  { %332 = vmatpush1.bf16.msra.mxu1 %v310_v13  ;;  %v4998_v10 = vld [vmem:[%s7713_s3 + $0x530] ss:$8 sps:$4 sm:$0xff]   ;;  %v5016_v28 = vld [vmem:[%s7713_s3 + $0x560] ss:$8 sps:$4 sm:$0xff]   ;;  %v5038_v55 = vld [vmem:[%s7713_s3 + $0x5a4] ss:$8 sps:$4 sm:$0xff]  }
  0x18   :  { %494 = vmatprep.subr.bf16.mxu1 %v4934_v14  ;;  %3755 = vmatpush1.bf16.msra.mxu0 %v4986_v62  ;;  %v4999_v14 = vld [vmem:[%s7713_s3 + $0x80] ss:$8 sps:$4 sm:$0xff]   ;;  %v5044_v62 = vld [vmem:[%s7713_s3 + $0x5b4] ss:$8 sps:$4 sm:$0xff]  }
  0x19   :  { %3756 = vmatprep.subr.bf16.mxu0 %v4990_v3  ;;  %v5040_v56 = vld [vmem:[%s7713_s3 + $0x5a0] ss:$8 sps:$4 sm:$0xff]  }
  0x1a   :  { %4344 = vmatmul.mubr.msk.bf16.vlgmr.msra.gmra.mrb[0].mxu1 %vm265_vm1, %v5737_v15 }
  0x1b   :  { %495 = vmatpush1.bf16.msra.mxu1 %v4932_v16  ;;  %363 = vmatprep.mubr.bf16.mxu1 %v5651_v1  ;;  %v5004_v16 = vld [vmem:[%s7713_s3 + $0x540] ss:$8 sps:$4 sm:$0xff]  }
  0x1c   :  { %496 = vmatprep.subr.bf16.mxu1 %v4939_v17  ;;  %3757 = vmatpush1.bf16.msra.mxu0 %v4992_v4  ;;  %v5007_v17 = vld [vmem:[%s7713_s3 + $0x94] ss:$8 sps:$4 sm:$0xff]   ;;  %v5049_v4 = vld [vmem:[%s7713_s3 + $0x104] ss:$8 sps:$4 sm:$0xff]  }
  0x1d   :  { %3758 = vmatprep.subr.bf16.mxu0 %v4996_v8  ;;  %v5052_v8 = vld [vmem:[%s7713_s3 + $0x5c0] ss:$8 sps:$4 sm:$0xff]  }
  0x1f   :  { %497 = vmatpush1.bf16.msra.mxu1 %v4937_v18  ;;  %v5005_v18 = vld [vmem:[%s7713_s3 + $0x90] ss:$8 sps:$4 sm:$0xff]  }
  0x20   :  { %498 = vmatprep.subr.bf16.mxu1 %v4944_v19  ;;  %3759 = vmatpush1.bf16.msra.mxu0 %v4998_v10 }
  0x22   :  { %4345 = vmatmul.mubr.msk.bf16.gmra.mrb[4].mxu1 %vm265_vm1, %v4935_v20 }
  0x23   :  { %373 = vmatprep.mubr.bf16.mxu1 %v5651_v1  ;;  %499 = vmatpush1.bf16.msra.mxu1 %v4942_v21 }
  0x24   :  { %500 = vmatprep.subr.bf16.mxu1 %v4950_v22  ;;  %v5010_v22 = vld [vmem:[%s7713_s3 + $0x550] ss:$8 sps:$4 sm:$0xff]  }
  0x27   :  { %501 = vmatpush1.bf16.msra.mxu1 %v4948_v23 }
  0x28   :  { %502 = vmatprep.subr.bf16.mxu1 %v4955_v24  ;;  %v5013_v24 = vld [vmem:[%s7713_s3 + $0xa4] ss:$8 sps:$4 sm:$0xff]  }
  0x2a   :  { %4346 = vmatmul.mubr.msk.bf16.gmra.mrb[8].mxu1 %vm265_vm1, %v4936_v25 }
  0x2b   :  { %383 = vmatprep.mubr.bf16.mxu1 %v5651_v1  ;;  %503 = vmatpush1.bf16.msra.mxu1 %v4953_v26  ;;  %v5011_v26 = vld [vmem:[%s7713_s3 + $0xa0] ss:$8 sps:$4 sm:$0xff]  }
  0x2c   :  { %4358 = vmatprep.subr.msk.bf16.mxu1 %vm308_vm0, %v4958_v27  ;;  %v5014_v27 = vld [vmem:[%s7713_s3 + $0x564] ss:$8 sps:$4 sm:$0xff]  }
  0x2f   :  { %505 = vmatpush1.bf16.msra.mxu1 %v316_v29  ;;  %v5019_v29 = vld [vmem:[%s7713_s3 + $0xb4] ss:$8 sps:$4 sm:$0xff]  }
  0x30   :  { %3547 = vmatprep.subr.bf16.mxu1 %v4965_v41  ;;  %v5031_v41 = vld [vmem:[%s7713_s3 + $0xd4] ss:$8 sps:$4 sm:$0xff]  }
  0x32   :  { %4347 = vmatmul.mubr.msk.bf16.gmra.mrb[12].mxu1 %vm265_vm1, %v4940_v30 }
  0x33   :  { %393 = vmatprep.mubr.bf16.mxu1 %v5651_v1 }
  0x3a   :  { %4348 = vmatmul.mubr.msk.bf16.gmra.mrb[16].mxu1 %vm265_vm1, %v4941_v31 }
  0x3b   :  { %403 = vmatprep.mubr.bf16.mxu1 %v5651_v1 }
  0x42   :  { %4349 = vmatmul.mubr.msk.bf16.gmra.mrb[20].mxu1 %vm265_vm1, %v4945_v32 }
  0x43   :  { %413 = vmatprep.mubr.bf16.mxu1 %v5651_v1 }
  0x4a   :  { %4350 = vmatmul.mubr.msk.bf16.gmra.mrb[24].mxu1 %vm265_vm1, %v4946_v33 }
  0x4b   :  { %423 = vmatprep.mubr.bf16.mxu1 %v5651_v1 }
  0x52   :  { %4351 = vmatmul.mubr.msk.bf16.gmra.mrb[28].mxu1 %vm265_vm1, %v4947_v34 }
  0x53   :  { %433 = vmatprep.mubr.bf16.mxu1 %v5651_v1 }
  0x5a   :  { %4352 = vmatmul.mubr.msk.bf16.gmra.mrb[32].mxu1 %vm265_vm1, %v4951_v35 }
  0x5b   :  { %443 = vmatprep.mubr.bf16.mxu1 %v5651_v1 }
  0x62   :  { %4353 = vmatmul.mubr.msk.bf16.gmra.mrb[36].mxu1 %vm265_vm1, %v4952_v36 }
  0x63   :  { %453 = vmatprep.mubr.bf16.mxu1 %v5651_v1 }
  0x6a   :  { %4354 = vmatmul.mubr.msk.bf16.gmra.mrb[40].mxu1 %vm265_vm1, %v4956_v37 }
  0x6b   :  { %463 = vmatprep.mubr.bf16.mxu1 %v5651_v1 }
  0x72   :  { %4355 = vmatmul.mubr.msk.bf16.gmra.mrb[44].mxu1 %vm265_vm1, %v4957_v38 }
  0x73   :  { %473 = vmatprep.mubr.bf16.mxu1 %v5651_v1 }
  0x7a   :  { %4356 = vmatmul.mubr.msk.bf16.gmra.mrb[48].mxu1 %vm265_vm1, %v4961_v39 }
  0x7b   :  { %483 = vmatprep.mubr.bf16.mxu1 %v5651_v1 }
  0x82   :  { %4357 = vmatmul.mubr.msk.bf16.gmra.mrb[52].mxu1 %vm265_vm1, %v4962_v40 }
  0x83   :  { %526 = vmatprep.mubr.bf16.mxu1 %v5651_v1 }
  0x8a   :  { %4359 = vmatmul.mubr.msk.bf16.vlgmr.msra.gmra.mrb[56].mxu1 %vm265_vm1, %v5737_v15  ;;  %v5002_v15 = vld [vmem:[%s7713_s3 + $0x544] ss:$8 sps:$4 sm:$0xff]  }
  0x8b   :  { %536 = vmatprep.mubr.bf16.mxu1 %v5651_v1  ;;  %3548 = vmatpush1.bf16.msra.mxu1 %v4963_v42  ;;  %v5029_v42 = vld [vmem:[%s7713_s3 + $0xd0] ss:$8 sps:$4 sm:$0xff]  }
  0x8c   :  { %3549 = vmatprep.subr.bf16.mxu1 %v4968_v43  ;;  %3760 = vmatprep.subr.bf16.mxu0 %v5002_v15  ;;  %v5056_v15 = vld [vmem:[%s7713_s3 + $0x5d4] ss:$8 sps:$4 sm:$0xff]  }
  0x8d   :  { %3761 = vmatpush1.bf16.msra.mxu0 %v5004_v16 }
  0x8f   :  { %3550 = vmatpush1.bf16.msra.mxu1 %v4966_v44  ;;  %v5032_v44 = vld [vmem:[%s7713_s3 + $0x594] ss:$8 sps:$4 sm:$0xff]  }
  0x90   :  { %3551 = vmatprep.subr.bf16.mxu1 %v4971_v45 }
  0x92   :  { %4360 = vmatmul.mubr.msk.bf16.gmra.mrb[60].mxu1 %vm265_vm1, %v4935_v20  ;;  %v5008_v20 = vld [vmem:[%s7713_s3 + $0x554] ss:$8 sps:$4 sm:$0xff]  }
  0x93   :  { %546 = vmatprep.mubr.bf16.mxu1 %v5651_v1  ;;  %3552 = vmatpush1.bf16.msra.mxu1 %v4969_v46  ;;  %v5034_v46 = vld [vmem:[%s7713_s3 + $0x590] ss:$8 sps:$4 sm:$0xff]  }
  0x94   :  { %3553 = vmatprep.subr.bf16.mxu1 %v4974_v47  ;;  %3762 = vmatprep.subr.bf16.mxu0 %v5008_v20 }
  0x95   :  { %3763 = vmatpush1.bf16.msra.mxu0 %v5010_v22 }
  0x96   :  { %3764 = vmatprep.subr.bf16.mxu0 %v5014_v27  ;;  %v5064_v27 = vld [vmem:[%s7713_s3 + $0x5e0] ss:$8 sps:$4 sm:$0xff]  }
  0x97   :  { %3554 = vmatpush1.bf16.msra.mxu1 %v4972_v48  ;;  %v5037_v48 = vld [vmem:[%s7713_s3 + $0xe4] ss:$8 sps:$4 sm:$0xff]  }
  0x98   :  { %3555 = vmatprep.subr.bf16.mxu1 %v4977_v52 }
  0x99   :  { %3765 = vmatpush1.bf16.msra.mxu0 %v5016_v28 }
  0x9a   :  { %4361 = vmatmul.mubr.msk.bf16.gmra.mrb[64].mxu1 %vm265_vm1, %v4936_v25 }
  0x9b   :  { %556 = vmatprep.mubr.bf16.mxu1 %v5651_v1  ;;  %3556 = vmatpush1.bf16.msra.mxu1 %v4975_v54  ;;  %v5035_v54 = vld [vmem:[%s7713_s3 + $0xe0] ss:$8 sps:$4 sm:$0xff]  }
  0x9c   :  { %3557 = vmatprep.subr.bf16.mxu1 %v4983_v57  ;;  %v5043_v57 = vld [vmem:[%s7713_s3 + $0xf4] ss:$8 sps:$4 sm:$0xff]  }
  0x9f   :  { %3558 = vmatpush1.bf16.msra.mxu1 %v4981_v58  ;;  %v5041_v58 = vld [vmem:[%s7713_s3 + $0xf0] ss:$8 sps:$4 sm:$0xff]  }
  0xa0   :  { %3559 = vmatprep.subr.bf16.mxu1 %v4989_v0 }
  0xa2   :  { %4362 = vmatmul.mubr.msk.bf16.gmra.mrb[68].mxu1 %vm265_vm1, %v4940_v30  ;;  %v5017_v30 = vld [vmem:[%s7713_s3 + $0xb0] ss:$8 sps:$4 sm:$0xff]  }
  0xa3   :  { %566 = vmatprep.mubr.bf16.mxu1 %v5651_v1  ;;  %3560 = vmatpush1.bf16.msra.mxu1 %v4987_v2  ;;  %v5046_v2 = vld [vmem:[%s7713_s3 + $0x5b0] ss:$8 sps:$4 sm:$0xff]  }
  0xa4   :  { %3561 = vmatprep.subr.bf16.mxu1 %v4995_v5 }
  0xa7   :  { %3562 = vmatpush1.bf16.msra.mxu1 %v4993_v6  ;;  %v5050_v6 = vld [vmem:[%s7713_s3 + $0x5c4] ss:$8 sps:$4 sm:$0xff]  }
  0xa8   :  { %3563 = vmatprep.subr.bf16.mxu1 %v5001_v12 }
  0xaa   :  { %4363 = vmatmul.mubr.msk.bf16.gmra.mrb[72].mxu1 %vm265_vm1, %v4941_v31 }
  0xab   :  { %576 = vmatprep.mubr.bf16.mxu1 %v5651_v1  ;;  %3564 = vmatpush1.bf16.msra.mxu1 %v4999_v14 }
  0xac   :  { %3565 = vmatprep.subr.bf16.mxu1 %v5007_v17 }
  0xaf   :  { %3566 = vmatpush1.bf16.msra.mxu1 %v5005_v18  ;;  %v5058_v18 = vld [vmem:[%s7713_s3 + $0x5d0] ss:$8 sps:$4 sm:$0xff]  }
  0xb0   :  { %3567 = vmatprep.subr.bf16.mxu1 %v5013_v24 }
  0xb2   :  { %4364 = vmatmul.mubr.msk.bf16.gmra.mrb[76].mxu1 %vm265_vm1, %v4945_v32  ;;  %v5020_v32 = vld [vmem:[%s7713_s3 + $0x574] ss:$8 sps:$4 sm:$0xff]  }
  0xb3   :  { %586 = vmatprep.mubr.bf16.mxu1 %v5651_v1  ;;  %3568 = vmatpush1.bf16.msra.mxu1 %v5011_v26  ;;  %v5062_v26 = vld [vmem:[%s7713_s3 + $0x5e4] ss:$8 sps:$4 sm:$0xff]  }
  0xb4   :  { %3569 = vmatprep.subr.bf16.mxu1 %v5019_v29  ;;  %3766 = vmatprep.subr.bf16.mxu0 %v5020_v32  ;;  %v5068_v32 = vld [vmem:[%s7713_s3 + $0x5f4] ss:$8 sps:$4 sm:$0xff]  }
  0xb7   :  { %3570 = vmatpush1.bf16.msra.mxu1 %v5017_v30 }
  0xba   :  { %4365 = vmatmul.mubr.msk.bf16.gmra.mrb[80].mxu1 %vm265_vm1, %v4946_v33 }
  0xbb   :  { %596 = vmatprep.mubr.bf16.mxu1 %v5651_v1 }
  0xc2   :  { %4366 = vmatmul.mubr.msk.bf16.gmra.mrb[84].mxu1 %vm265_vm1, %v4947_v34  ;;  %v5022_v34 = vld [vmem:[%s7713_s3 + $0x570] ss:$8 sps:$4 sm:$0xff]  }
  0xc3   :  { %606 = vmatprep.mubr.bf16.mxu1 %v5651_v1  ;;  %3767 = vmatpush1.bf16.msra.mxu0 %v5022_v34 }
  0xca   :  { %4367 = vmatmul.mubr.msk.bf16.gmra.mrb[88].mxu1 %vm265_vm1, %v4951_v35 }
  0xcb   :  { %616 = vmatprep.mubr.bf16.mxu1 %v5651_v1 }
  0xd2   :  { %4368 = vmatmul.mubr.msk.bf16.gmra.mrb[92].mxu1 %vm265_vm1, %v4952_v36  ;;  %v5025_v36 = vld [vmem:[%s7713_s3 + $0xc4] ss:$8 sps:$4 sm:$0xff]  }
  0xd3   :  { %626 = vmatprep.mubr.bf16.mxu1 %v5651_v1  ;;  %3571 = vmatprep.subr.bf16.mxu1 %v5025_v36 }
  0xda   :  { %4369 = vmatmul.mubr.msk.bf16.gmra.mrb[96].mxu1 %vm265_vm1, %v4956_v37 }
  0xdb   :  { %636 = vmatprep.mubr.bf16.mxu1 %v5651_v1 }
  0xe2   :  { %4370 = vmatmul.mubr.msk.bf16.gmra.mrb[100].mxu1 %vm265_vm1, %v4957_v38  ;;  %v5023_v38 = vld [vmem:[%s7713_s3 + $0xc0] ss:$8 sps:$4 sm:$0xff]  }
  0xe3   :  { %646 = vmatprep.mubr.bf16.mxu1 %v5651_v1  ;;  %3572 = vmatpush1.bf16.msra.mxu1 %v5023_v38  ;;  %v5070_v38 = vld [vmem:[%s7713_s3 + $0x5f0] ss:$8 sps:$4 sm:$0xff]  }
  0xe4   :  { %3573 = vmatprep.subr.bf16.mxu1 %v5031_v41 }
  0xe7   :  { %3574 = vmatpush1.bf16.msra.mxu1 %v5029_v42  ;;  %v5076_v42 = vld [vmem:[%s7713_s3 + $0x604] ss:$8 sps:$4 sm:$0xff]  }
  0xe8   :  { %3575 = vmatprep.subr.bf16.mxu1 %v5037_v48 }
  0xea   :  { %4371 = vmatmul.mubr.msk.bf16.gmra.mrb[104].mxu1 %vm265_vm1, %v4961_v39  ;;  %v5026_v39 = vld [vmem:[%s7713_s3 + $0x584] ss:$8 sps:$4 sm:$0xff]  }
  0xeb   :  { %656 = vmatprep.mubr.bf16.mxu1 %v5651_v1  ;;  %3768 = vmatprep.subr.bf16.mxu0 %v5026_v39 }
  0xec   :  { %3576 = vmatpush1.bf16.msra.mxu1 %v5035_v54 }
  0xed   :  { %v5893_v49 = vpop.f32.mrb[0].mxu1  ;;  %3577 = vmatprep.subr.bf16.mxu1 %v5043_v57 }
  0xee   :  { %v5895_v50 = vpop.f32.mrb[1].mxu1 }
  0xef   :  { %v5897_v51 = vpop.f32.mrb[2].mxu1 }
  0xf0   :  { %v5902_v53 = vpop.f32.mrb[3].mxu1  ;;  %3578 = vmatpush1.bf16.msra.mxu1 %v5041_v58 }
  0xf1   :  { %3588 = vmatprep.subr.bf16.mxu1 %v5049_v4 }
  0xf2   :  { %4372 = vmatmul.mubr.msk.bf16.gmra.mrb[108].mxu1 %vm265_vm1, %v4962_v40  ;;  %v5028_v40 = vld [vmem:[%s7713_s3 + $0x580] ss:$8 sps:$4 sm:$0xff]  }
  0xf3   :  { %3769 = vmatpush1.bf16.msra.mxu0 %v5028_v40 }
  0xf4   :  { %3770 = vmatprep.subr.bf16.mxu0 %v5032_v44 }
  0xf5   :  { %v5920_v59 = vpop.f32.mrb[4].mxu1 }
  0xf6   :  { %v5925_v61 = vpop.f32.mrb[5].mxu1 }
  0xf7   :  { %v5930_v63 = vpop.f32.mrb[6].mxu1  ;;  %3771 = vmatpush1.bf16.msra.mxu0 %v5034_v46 }
  0xf8   :  { %v5935_v1 = vpop.f32.mrb[7].mxu1  ;;  %3772 = vmatprep.subr.bf16.mxu0 %v5038_v55 }
  0xfb   :  { %3773 = vmatpush1.bf16.msra.mxu0 %v5040_v56 }
  0xfc   :  { %3774 = vmatprep.subr.bf16.mxu0 %v5044_v62 }
  0xfd   :  { %v5952_v7 = vpop.f32.mrb[8].mxu1 }
  0xfe   :  { %v5957_v9 = vpop.f32.mrb[9].mxu1 }
  0xff   :  { %v5962_v11 = vpop.f32.mrb[10].mxu1  ;;  %3775 = vmatpush1.bf16.msra.mxu0 %v5046_v2 }
 0x100   :  { %v5967_v13 = vpop.f32.mrb[11].mxu1  ;;  %3776 = vmatprep.subr.bf16.mxu0 %v5050_v6 }
 0x103   :  { %3777 = vmatpush1.bf16.msra.mxu0 %v5052_v8 }
 0x104   :  { %3778 = vmatprep.subr.bf16.mxu0 %v5056_v15 }
 0x105   :  { %v5984_v19 = vpop.f32.mrb[12].mxu1 }
 0x106   :  { %v5989_v21 = vpop.f32.mrb[13].mxu1 }
 0x107   :  { %v5994_v23 = vpop.f32.mrb[14].mxu1  ;;  %3779 = vmatpush1.bf16.msra.mxu0 %v5058_v18 }
 0x108   :  { %v5999_v25 = vpop.f32.mrb[15].mxu1  ;;  %3780 = vmatprep.subr.bf16.mxu0 %v5062_v26 }
 0x10b   :  { %3781 = vmatpush1.bf16.msra.mxu0 %v5064_v27 }
 0x10c   :  { %3782 = vmatprep.subr.bf16.mxu0 %v5068_v32 }
 0x10d   :  { %v6016_v31 = vpop.f32.mrb[16].mxu1 }
 0x10e   :  { %7745 = vst [vmem:[#allocation2_spill] sm:$0xff] %v6016_v31  ;;  %v6021_v33 = vpop.f32.mrb[17].mxu1 }
 0x10f   :  { %7746 = vst [vmem:[#allocation3_spill] sm:$0xff] %v6021_v33  ;;  %v6026_v35 = vpop.f32.mrb[18].mxu1  ;;  %3783 = vmatpush1.bf16.msra.mxu0 %v5070_v38 }
 0x110   :  { %7747 = vst [vmem:[#allocation4_spill] sm:$0xff] %v6026_v35  ;;  %v6031_v37 = vpop.f32.mrb[19].mxu1  ;;  %3793 = vmatprep.subr.bf16.mxu0 %v5076_v42 }
 0x111   :  { %7748 = vst [vmem:[#allocation5_spill] sm:$0xff] %v6031_v37 }
 0x115   :  { %v6048_v43 = vpop.f32.mrb[20].mxu1 }
 0x116   :  { %7749 = vst [vmem:[#allocation6_spill] sm:$0xff] %v6048_v43  ;;  %v6053_v45 = vpop.f32.mrb[21].mxu1 }
 0x117   :  { %7750 = vst [vmem:[#allocation7_spill] sm:$0xff] %v6053_v45  ;;  %v6058_v47 = vpop.f32.mrb[22].mxu1 }
 0x118   :  { %7751 = vst [vmem:[#allocation8_spill] sm:$0xff] %v6058_v47  ;;  %v6063_v52 = vpop.f32.mrb[23].mxu1 }
 0x119   :  { %7752 = vst [vmem:[#allocation9_spill] sm:$0xff] %v6063_v52 }
 0x11d   :  { %v6080_v60 = vpop.f32.mrb[24].mxu1 }
 0x11e   :  { %7753 = vst [vmem:[#allocation10_spill] sm:$0xff] %v6080_v60  ;;  %v6085_v0 = vpop.f32.mrb[25].mxu1 }
 0x11f   :  { %7754 = vst [vmem:[#allocation11_spill] sm:$0xff] %v6085_v0  ;;  %v6090_v3 = vpop.f32.mrb[26].mxu1 }
 0x120   :  { %7755 = vst [vmem:[#allocation12_spill] sm:$0xff] %v6090_v3  ;;  %v6095_v5 = vpop.f32.mrb[27].mxu1 }
 0x121   :  { %7756 = vst [vmem:[#allocation13_spill] sm:$0xff] %v6095_v5 }
 0x125   :  { %v6103_v10 = vpop.f32.mrb[28].mxu1 }
 0x126   :  { %v6107_v14 = vpop.f32.mrb[29].mxu1 }
 0x127   :  { %v6114_v17 = vpop.f32.mrb[30].mxu1 }
 0x128   :  { %v6121_v22 = vpop.f32.mrb[31].mxu1 }
 0x12d   :  { %v6131_v28 = vpop.f32.mrb[32].mxu1 }
 0x12e   :  { %v6135_v30 = vpop.f32.mrb[33].mxu1 }
 0x12f   :  { %v6142_v36 = vpop.f32.mrb[34].mxu1 }
 0x130   :  { %v6149_v40 = vpop.f32.mrb[35].mxu1 }
 0x135   :  { %v6156_v44 = vpop.f32.mrb[36].mxu1 }
 0x136   :  { %v6160_v48 = vpop.f32.mrb[37].mxu1 }
 0x137   :  { %v6164_v55 = vpop.f32.mrb[38].mxu1 }
 0x138   :  { %v6168_v57 = vpop.f32.mrb[39].mxu1 }
 0x13d   :  { %v6172_v62 = vpop.f32.mrb[40].mxu1 }
 0x13e   :  { %v6176_v4 = vpop.f32.mrb[41].mxu1 }
 0x13f   :  { %v6180_v8 = vpop.f32.mrb[42].mxu1 }
 0x140   :  { %v6184_v18 = vpop.f32.mrb[43].mxu1 }
 0x145   :  { %v6188_v27 = vpop.f32.mrb[44].mxu1 }
 0x146   :  { %7757 = vst [vmem:[#allocation14_spill] sm:$0xff] %v6188_v27  ;;  %v6192_v38 = vpop.f32.mrb[45].mxu1 }
 0x147   :  { %7758 = vst [vmem:[#allocation15_spill] sm:$0xff] %v6192_v38  ;;  %v6196_v6 = vpop.f32.mrb[46].mxu1 }
 0x148   :  { %7759 = vst [vmem:[#allocation16_spill] sm:$0xff] %v6196_v6  ;;  %v6200_v2 = vpop.f32.mrb[47].mxu1 }
 0x149   :  { %7760 = vst [vmem:[#allocation17_spill] sm:$0xff] %v6200_v2  ;;  %v753_v2 = vlaneseq }
 0x14b   :  { %v6278_v35 = vshrl.u32 %v753_v2, 7 }
 0x14d   :  { %v6204_v58 = vpop.f32.mrb[48].mxu1 }
 0x14e   :  { %7761 = vst [vmem:[#allocation18_spill] sm:$0xff] %v6204_v58  ;;  %v6208_v56 = vpop.f32.mrb[49].mxu1 }
 0x14f   :  { %7762 = vst [vmem:[#allocation19_spill] sm:$0xff] %v6208_v56  ;;  %v6212_v54 = vpop.f32.mrb[50].mxu1 }
 0x150   :  { %7763 = vst [vmem:[#allocation20_spill] sm:$0xff] %v6212_v54  ;;  %v6216_v46 = vpop.f32.mrb[51].mxu1 }
 0x151   :  { %7764 = vst [vmem:[#allocation21_spill] sm:$0xff] %v6216_v46 }
 0x155   :  { %v6220_v41 = vpop.f32.mrb[52].mxu1 }
 0x156   :  { %7765 = vst [vmem:[#allocation22_spill] sm:$0xff] %v6220_v41  ;;  %v6224_v39 = vpop.f32.mrb[53].mxu1 }
 0x157   :  { %7766 = vst [vmem:[#allocation23_spill] sm:$0xff] %v6224_v39  ;;  %v6228_v34 = vpop.f32.mrb[54].mxu1 }
 0x158   :  { %7767 = vst [vmem:[#allocation24_spill] sm:$0xff] %v6228_v34  ;;  %v6232_v29 = vpop.f32.mrb[55].mxu1 }
 0x159   :  { %7768 = vst [vmem:[#allocation25_spill] sm:$0xff] %v6232_v29 }
 0x15d   :  { %v528_v24 = vpop.f32.mrb[56].mxu1 }
 0x15e   :  { %v530_v20 = vpop.f32.mrb[57].mxu1 }
 0x15f   :  { %v532_v16 = vpop.f32.mrb[58].mxu1 }
 0x160   :  { %v534_v12 = vpop.f32.mrb[59].mxu1 }
 0x165   :  { %v538_v32 = vpop.f32.mrb[60].mxu1 }
 0x166   :  { %v6236_v41 = vpop.f32.mrb[61].mxu1 }
 0x167   :  { %v6238_v60 = vpop.f32.mrb[62].mxu1 }
 0x168   :  { %v6240_v42 = vpop.f32.mrb[63].mxu1 }
 0x16d   :  { %v6242_v39 = vpop.f32.mrb[64].mxu1 }
 0x16e   :  { %v6244_v0 = vpop.f32.mrb[65].mxu1 }
 0x16f   :  { %v6246_v15 = vpop.f32.mrb[66].mxu1 }
 0x170   :  { %v6248_v34 = vpop.f32.mrb[67].mxu1 }
 0x175   :  { %v6250_v26 = vpop.f32.mrb[68].mxu1 }
 0x176   :  { %v6252_v29 = vpop.f32.mrb[69].mxu1 }
 0x177   :  { %v6254_v5 = vpop.f32.mrb[70].mxu1 }
 0x178   :  { %v6256_v3 = vpop.f32.mrb[71].mxu1 }
 0x17d   :  { %v6258_v46 = vpop.f32.mrb[72].mxu1 }
 0x17e   :  { %7769 = vst [vmem:[#allocation26_spill] sm:$0xff] %v6258_v46  ;;  %v6260_v52 = vpop.f32.mrb[73].mxu1 }
 0x17f   :  { %7770 = vst [vmem:[#allocation27_spill] sm:$0xff] %v6260_v52  ;;  %v6262_v54 = vpop.f32.mrb[74].mxu1 }
 0x180   :  { %7771 = vst [vmem:[#allocation28_spill] sm:$0xff] %v6262_v54  ;;  %v6264_v47 = vpop.f32.mrb[75].mxu1  ;;  %v7781_v54 = vmax.f32 %v5893_v49, %v6103_v10 }
 0x181   :  { %7772 = vst [vmem:[#allocation29_spill] sm:$0xff] %v6264_v47  ;;  %v7743_v47 = vsub.s32 0, %v6278_v35 }
 0x185   :  { %v6266_v56 = vpop.f32.mrb[76].mxu1 }
 0x186   :  { %7773 = vst [vmem:[#allocation30_spill] sm:$0xff] %v6266_v56  ;;  %v6268_v45 = vpop.f32.mrb[77].mxu1 }
 0x187   :  { %7774 = vst [vmem:[#allocation31_spill] sm:$0xff] %v6268_v45  ;;  %v6270_v58 = vpop.f32.mrb[78].mxu1  ;;  %v751_v45 = vld [vmem:[%s7714_s2] sm:$0x3] }
 0x188   :  { %7775 = vst [vmem:[#allocation32_spill] sm:$0xff] %v6270_v58  ;;  %v6272_v43 = vpop.f32.mrb[79].mxu1  ;;  %v7744_v58 = vsub.s32 1, %v6278_v35 }
 0x189   :  { %7776 = vst [vmem:[#allocation33_spill] sm:$0xff] %v6272_v43 }
 0x18d   :  { %v6274_v37 = vpop.f32.mrb[80].mxu1 }
 0x18e   :  { %7777 = vst [vmem:[#allocation34_spill] sm:$0xff] %v6274_v37  ;;  %v6276_v6 = vpop.f32.mrb[81].mxu1  ;;  %v6291_v37 = vrot.slane %v751_v45, %v7743_v47 }
 0x18f   :  { %7778 = vst [vmem:[#allocation35_spill] sm:$0xff] %v6276_v6  ;;  %v6280_v38 = vpop.f32.mrb[82].mxu1 }
 0x190   :  { %7779 = vst [vmem:[#allocation36_spill] sm:$0xff] %v6280_v38  ;;  %v6282_v33 = vpop.f32.mrb[83].mxu1  ;;  %v6295_v38 = vrot.slane %v751_v45, %v7744_v58  ;;  %v7784_v58 = vmax.f32 %v5902_v53, %v6121_v22 }
 0x191   :  { %7780 = vst [vmem:[#allocation37_spill] sm:$0xff] %v6282_v33 }
 0x195   :  { %v598_v43 = vpop.f32.mrb[84].mxu1 }
 0x196   :  { %v669_v56 = vmax.f32 %v528_v24, %v598_v43  ;;  %v600_v2 = vpop.f32.mrb[85].mxu1  ;;  %v7782_v43 = vmax.f32 %v5895_v50, %v6107_v14 }
 0x197   :  { %v670_v6 = vmax.f32 %v530_v20, %v600_v2  ;;  %v602_v33 = vpop.f32.mrb[86].mxu1  ;;  %v7783_v20 = vmax.f32 %v5897_v51, %v6114_v17  ;;  %v5047_v17 = vld [vmem:[%s7713_s3 + $0x100] ss:$8 sps:$4 sm:$0xff]  }
 0x198   :  { %v723_v27 = vmax.f32 %v7781_v54, %v669_v56  ;;  %v673_v31 = vmax.f32 %v532_v16, %v602_v33  ;;  %v604_v52 = vpop.f32.mrb[87].mxu1 }
 0x199   :  { %v724_v24 = vmax.f32 %v7782_v43, %v670_v6  ;;  %v674_v46 = vmax.f32 %v534_v12, %v604_v52  ;;  %v5055_v6 = vld [vmem:[%s7713_s3 + $0x114] ss:$8 sps:$4 sm:$0xff]  }
 0x19a   :  { %v763_v47 = vadd.f32 %v6291_v37, %v723_v27  ;;  %v725_v2 = vmax.f32 %v7783_v20, %v673_v31  ;;  %v7788_v20 = vmax.f32 %v5935_v1, %v6149_v40 }
 0x19b   :  { %v764_v45 = vadd.f32 %v6295_v38, %v724_v24  ;;  %v726_v49 = vmax.f32 %v7784_v58, %v674_v46 }
 0x19c   :  { %v791_v10 = vmax.f32 %v763_v47, 0.0  ;;  %v6312_v33 = vadd.f32 %v6291_v37, %v725_v2  ;;  %v7785_v47 = vmax.f32 %v5920_v59, %v6131_v28  ;;  %v7787_v59 = vmax.f32 %v5930_v63, %v6142_v36  ;;  %v5061_v63 = vld [vmem:[%s7713_s3 + $0x124] ss:$8 sps:$4 sm:$0xff]  }
 0x19d   :  { %v766_v50 = vadd.f32 %v6295_v38, %v726_v49  ;;  %v608_v14 = vpop.f32.mrb[88].mxu1  ;;  %v792_v52 = vmax.f32 %v764_v45, 0.0 }
 0x19e   :  { %v677_v12 = vmax.f32 %v538_v32, %v608_v14  ;;  %v610_v16 = vpop.f32.mrb[89].mxu1  ;;  %v819_v22 = vpack.c.bf16 %v791_v10, %v791_v10  ;;  %v5059_v10 = vld [vmem:[%s7713_s3 + $0x120] ss:$8 sps:$4 sm:$0xff]  }
 0x19f   :  { %v678_v54 = vmax.f32 %v6236_v41, %v610_v16  ;;  %v612_v51 = vpop.f32.mrb[90].mxu1  ;;  %v820_v31 = vpack.c.bf16 %v792_v52, %v792_v52  ;;  %v794_v53 = vmax.f32 %v766_v50, 0.0  ;;  %v7786_v41 = vmax.f32 %v5925_v61, %v6135_v30  ;;  %v5053_v30 = vld [vmem:[%s7713_s3 + $0x110] ss:$8 sps:$4 sm:$0xff]  }
 0x1a0   :  { %v727_v46 = vmax.f32 %v7785_v47, %v677_v12  ;;  %v681_v56 = vmax.f32 %v6238_v60, %v612_v51  ;;  %v614_v58 = vpop.f32.mrb[91].mxu1  ;;  %v7789_v50 = vmax.f32 %v5952_v7, %v6156_v44  ;;  %v7791_v7 = vmax.f32 %v5962_v11, %v6164_v55  ;;  %v5073_v11 = vld [vmem:[%s7713_s3 + $0x144] ss:$8 sps:$4 sm:$0xff]  }
 0x1a1   :  { %v728_v27 = vmax.f32 %v7786_v41, %v678_v54  ;;  %v682_v32 = vmax.f32 %v6240_v42, %v614_v58  ;;  %3579 = vmatprep.mubr.bf16.mxu1 %v820_v31  ;;  %v822_v43 = vpack.c.bf16 %v794_v53, %v794_v53  ;;  %v7792_v31 = vmax.f32 %v5967_v13, %v6168_v57 }
 0x1a2   :  { %v6331_v24 = vadd.f32 %v6291_v37, %v727_v46  ;;  %v729_v60 = vmax.f32 %v7787_v59, %v681_v56  ;;  %3580 = vmatmul.mubr.bf16.vlgmr.msra.gmra.mrb[112].mxu1 %v819_v22  ;;  %v5071_v46 = vld [vmem:[%s7713_s3 + $0x140] ss:$8 sps:$4 sm:$0xff]   ;;  %v7793_v58 = vmax.f32 %v5984_v19, %v6172_v62 }
 0x1a3   :  { %v6337_v28 = vadd.f32 %v6295_v38, %v728_v27  ;;  %v730_v61 = vmax.f32 %v7788_v20, %v682_v32  ;;  %3589 = vmatpush1.bf16.msra.mxu1 %v5047_v17  ;;  %3620 = vmatprep.mubr.bf16.mxu1 %v822_v43  ;;  %v5074_v19 = vld [vmem:[%s7713_s3 + $0x600] ss:$8 sps:$4 sm:$0xff]  }
 0x1a4   :  { %v6346_v42 = vadd.f32 %v6291_v37, %v729_v60  ;;  %3590 = vmatprep.subr.bf16.mxu1 %v5055_v6 }
 0x1a5   :  { %v6352_v36 = vadd.f32 %v6295_v38, %v730_v61  ;;  %v618_v2 = vpop.f32.mrb[92].mxu1 }
 0x1a6   :  { %v685_v1 = vmax.f32 %v6242_v39, %v618_v2  ;;  %v620_v40 = vpop.f32.mrb[93].mxu1  ;;  %v5067_v39 = vld [vmem:[%s7713_s3 + $0x134] ss:$8 sps:$4 sm:$0xff]  }
 0x1a7   :  { %v686_v45 = vmax.f32 %v6244_v0, %v620_v40  ;;  %3591 = vmatpush1.bf16.msra.mxu1 %v5053_v30  ;;  %v622_v49 = vpop.f32.mrb[94].mxu1  ;;  %v7790_v0 = vmax.f32 %v5957_v9, %v6160_v48  ;;  %v5065_v9 = vld [vmem:[%s7713_s3 + $0x130] ss:$8 sps:$4 sm:$0xff]  }
 0x1a8   :  { %v731_v14 = vmax.f32 %v7789_v50, %v685_v1  ;;  %v689_v52 = vmax.f32 %v6246_v15, %v622_v49  ;;  %v624_v12 = vpop.f32.mrb[95].mxu1  ;;  %3592 = vmatprep.subr.bf16.mxu1 %v5061_v63  ;;  %v5077_v30 = vld [vmem:[%s7713_s3 + $0x150] ss:$8 sps:$4 sm:$0xff]   ;;  %v7797_v1 = vld [vmem:[#allocation26_spill] sm:$0xff] }
 0x1a9   :  { %v732_v16 = vmax.f32 %v7790_v0, %v686_v45  ;;  %v690_v54 = vmax.f32 %v6248_v34, %v624_v12  ;;  %v5088_v49 = vld [vmem:[%s7713_s3 + $0x624] ss:$8 sps:$4 sm:$0xff]  }
 0x1aa   :  { %v6371_v51 = vadd.f32 %v6291_v37, %v731_v14  ;;  %v733_v44 = vmax.f32 %v7791_v7, %v689_v52  ;;  %v5083_v52 = vld [vmem:[%s7713_s3 + $0x160] ss:$8 sps:$4 sm:$0xff]   ;;  %v7802_v7 = vld [vmem:[#allocation28_spill] sm:$0xff] }
 0x1ab   :  { %v6377_v15 = vadd.f32 %v6295_v38, %v732_v16  ;;  %v734_v17 = vmax.f32 %v7792_v31, %v690_v54  ;;  %3593 = vmatpush1.bf16.msra.mxu1 %v5059_v10  ;;  %v7798_v10 = vld [vmem:[#allocation27_spill] sm:$0xff]  ;;  %v7800_v0 = vld [vmem:[#allocation14_spill] sm:$0xff] }
 0x1ac   :  { %v773_v34 = vadd.f32 %v6291_v37, %v733_v44  ;;  %3594 = vmatprep.subr.bf16.mxu1 %v5067_v39  ;;  %v7799_v39 = vld [vmem:[#allocation2_spill] sm:$0xff] }
 0x1ad   :  { %v628_v48 = vpop.f32.mrb[96].mxu1  ;;  %v774_v55 = vadd.f32 %v6295_v38, %v734_v17  ;;  %v7801_v16 = vmax.f32 %v7799_v39, %v7800_v0  ;;  %v5091_v17 = vld [vmem:[%s7713_s3 + $0x174] ss:$8 sps:$4 sm:$0xff]  }
 0x1ae   :  { %v693_v53 = vmax.f32 %v6250_v26, %v628_v48  ;;  %v630_v22 = vpop.f32.mrb[97].mxu1  ;;  %v801_v13 = vmax.f32 %v773_v34, 0.0  ;;  %v5079_v26 = vld [vmem:[%s7713_s3 + $0x154] ss:$8 sps:$4 sm:$0xff]   ;;  %v7804_v34 = vld [vmem:[#allocation15_spill] sm:$0xff] }
 0x1af   :  { %v694_v57 = vmax.f32 %v6252_v29, %v630_v22  ;;  %3595 = vmatpush1.bf16.msra.mxu1 %v5065_v9  ;;  %v632_v47 = vpop.f32.mrb[98].mxu1  ;;  %v802_v56 = vmax.f32 %v774_v55, 0.0  ;;  %v7794_v29 = vmax.f32 %v5989_v21, %v6176_v4  ;;  %v5082_v21 = vld [vmem:[%s7713_s3 + $0x614] ss:$8 sps:$4 sm:$0xff]   ;;  %v7803_v9 = vld [vmem:[#allocation3_spill] sm:$0xff] }
 0x1b0   :  { %v735_v6 = vmax.f32 %v7793_v58, %v693_v53  ;;  %v697_v41 = vmax.f32 %v6254_v5, %v632_v47  ;;  %v634_v27 = vpop.f32.mrb[99].mxu1  ;;  %3596 = vmatprep.subr.bf16.mxu1 %v5073_v11  ;;  %v7795_v5 = vmax.f32 %v5994_v23, %v6180_v8  ;;  %v829_v20 = vpack.c.bf16 %v801_v13, %v801_v13  ;;  %v5085_v8 = vld [vmem:[%s7713_s3 + $0x164] ss:$8 sps:$4 sm:$0xff]   ;;  %v7806_v55 = vld [vmem:[#allocation29_spill] sm:$0xff]  ;;  %v5086_v22 = vld [vmem:[%s7713_s3 + $0x620] ss:$8 sps:$4 sm:$0xff]  }
 0x1b1   :  { %v736_v32 = vmax.f32 %v7794_v29, %v694_v57  ;;  %v698_v43 = vmax.f32 %v6256_v3, %v634_v27  ;;  %v830_v59 = vpack.c.bf16 %v802_v56, %v802_v56  ;;  %v7796_v3 = vmax.f32 %v5999_v25, %v6184_v18  ;;  %v5080_v18 = vld [vmem:[%s7713_s3 + $0x610] ss:$8 sps:$4 sm:$0xff]   ;;  %v5094_v58 = vld [vmem:[%s7713_s3 + $0x634] ss:$8 sps:$4 sm:$0xff]  }
 0x1b2   :  { %v6410_v62 = vadd.f32 %v6291_v37, %v735_v6  ;;  %v737_v60 = vmax.f32 %v7795_v5, %v697_v41  ;;  %v7805_v11 = vmax.f32 %v7803_v9, %v7804_v34  ;;  %v7807_v57 = vld [vmem:[#allocation4_spill] sm:$0xff]  ;;  %v7810_v41 = vld [vmem:[#allocation5_spill] sm:$0xff] }
 0x1b3   :  { %v776_v4 = vadd.f32 %v6295_v38, %v736_v32  ;;  %v738_v61 = vmax.f32 %v7796_v3, %v698_v43  ;;  %3597 = vmatpush1.bf16.msra.mxu1 %v5071_v46  ;;  %3784 = vmatprep.mubr.bf16.mxu0 %v830_v59  ;;  %v7808_v47 = vld [vmem:[#allocation16_spill] sm:$0xff]  ;;  %v7811_v27 = vld [vmem:[#allocation17_spill] sm:$0xff]  ;;  %v5097_v59 = vld [vmem:[%s7713_s3 + $0x184] ss:$8 sps:$4 sm:$0xff]  }
 0x1b4   :  { %v6426_v23 = vadd.f32 %v6291_v37, %v737_v60  ;;  %3785 = vmatmul.mubr.bf16.vlgmr.msra.gmra.mrb[0].mxu0 %v829_v20  ;;  %3598 = vmatprep.subr.bf16.mxu1 %v5079_v26  ;;  %v7809_v46 = vmax.f32 %v7807_v57, %v7808_v47  ;;  %v7812_v26 = vmax.f32 %v7810_v41, %v7811_v27  ;;  %v5089_v32 = vld [vmem:[%s7713_s3 + $0x170] ss:$8 sps:$4 sm:$0xff]   ;;  %v7813_v20 = vld [vmem:[#allocation30_spill] sm:$0xff]  ;;  %v5106_v34 = vld [vmem:[%s7713_s3 + $0x654] ss:$8 sps:$4 sm:$0xff]  }
 0x1b5   :  { %v6432_v63 = vadd.f32 %v6295_v38, %v738_v61  ;;  %3794 = vmatpush1.bf16.msra.mxu0 %v5074_v19  ;;  %v638_v25 = vpop.f32.mrb[100].mxu1  ;;  %v804_v2 = vmax.f32 %v776_v4, 0.0  ;;  %v5092_v60 = vld [vmem:[%s7713_s3 + $0x630] ss:$8 sps:$4 sm:$0xff]   ;;  %v5100_v3 = vld [vmem:[%s7713_s3 + $0x644] ss:$8 sps:$4 sm:$0xff]  }
 0x1b6   :  { %v701_v40 = vmax.f32 %v7797_v1, %v638_v25  ;;  %v640_v45 = vpop.f32.mrb[101].mxu1  ;;  %3795 = vmatprep.subr.bf16.mxu0 %v5082_v21  ;;  %v7814_v61 = vld [vmem:[#allocation31_spill] sm:$0xff]  ;;  %v7822_v0 = vld [vmem:[#allocation33_spill] sm:$0xff]  ;;  %v7829_v27 = vld [vmem:[#allocation34_spill] sm:$0xff] }
 0x1b7   :  { %v702_v50 = vmax.f32 %v7798_v10, %v640_v45  ;;  %3599 = vmatpush1.bf16.msra.mxu1 %v5077_v30  ;;  %v642_v14 = vpop.f32.mrb[102].mxu1  ;;  %v832_v12 = vpack.c.bf16 %v804_v2, %v804_v2  ;;  %v5095_v25 = vld [vmem:[%s7713_s3 + $0x180] ss:$8 sps:$4 sm:$0xff]   ;;  %v7818_v45 = vld [vmem:[#allocation32_spill] sm:$0xff] }
 0x1b8   :  { %v739_v54 = vmax.f32 %v7801_v16, %v701_v40  ;;  %v705_v44 = vmax.f32 %v7802_v7, %v642_v14  ;;  %v644_v31 = vpop.f32.mrb[103].mxu1  ;;  %3600 = vmatprep.subr.bf16.mxu1 %v5085_v8  ;;  %v7816_v2 = vld [vmem:[#allocation18_spill] sm:$0xff]  ;;  %v7819_v14 = vld [vmem:[#allocation7_spill] sm:$0xff]  ;;  %v5101_v57 = vld [vmem:[%s7713_s3 + $0x190] ss:$8 sps:$4 sm:$0xff]  }
 0x1b9   :  { %v740_v48 = vmax.f32 %v7805_v11, %v702_v50  ;;  %v706_v53 = vmax.f32 %v7806_v55, %v644_v31  ;;  %3796 = vmatpush1.bf16.msra.mxu0 %v5080_v18  ;;  %3825 = vmatprep.mubr.bf16.mxu0 %v832_v12  ;;  %v7815_v18 = vld [vmem:[#allocation6_spill] sm:$0xff]  ;;  %v5103_v50 = vld [vmem:[%s7713_s3 + $0x194] ss:$8 sps:$4 sm:$0xff]   ;;  %v5104_v41 = vld [vmem:[%s7713_s3 + $0x650] ss:$8 sps:$4 sm:$0xff]  }
 0x1ba   :  { %v6460_v13 = vadd.f32 %v6291_v37, %v739_v54  ;;  %v741_v56 = vmax.f32 %v7809_v46, %v705_v44  ;;  %3797 = vmatprep.subr.bf16.mxu0 %v5088_v49  ;;  %v7817_v1 = vmax.f32 %v7815_v18, %v7816_v2  ;;  %v5098_v54 = vld [vmem:[%s7713_s3 + $0x640] ss:$8 sps:$4 sm:$0xff]   ;;  %v7823_v44 = vld [vmem:[#allocation8_spill] sm:$0xff]  ;;  %v7827_v55 = vld [vmem:[#allocation21_spill] sm:$0xff] }
 0x1bb   :  { %v6469_v6 = vadd.f32 %v6295_v38, %v740_v48  ;;  %v742_v29 = vmax.f32 %v7812_v26, %v706_v53  ;;  %3601 = vmatpush1.bf16.msra.mxu1 %v5083_v52  ;;  %v7820_v52 = vld [vmem:[#allocation19_spill] sm:$0xff]  ;;  %v7824_v31 = vld [vmem:[#allocation20_spill] sm:$0xff]  ;;  %v7826_v48 = vld [vmem:[#allocation9_spill] sm:$0xff] }
 0x1bc   :  { %v6478_v43 = vadd.f32 %v6291_v37, %v741_v56  ;;  %3602 = vmatprep.subr.bf16.mxu1 %v5091_v17  ;;  %v7821_v12 = vmax.f32 %v7819_v14, %v7820_v52  ;;  %v7825_v17 = vmax.f32 %v7823_v44, %v7824_v31  ;;  %v7828_v53 = vmax.f32 %v7826_v48, %v7827_v55  ;;  %v5109_v46 = vld [vmem:[%s7713_s3 + $0x1a4] ss:$8 sps:$4 sm:$0xff]   ;;  %v5115_v18 = vld [vmem:[%s7713_s3 + $0x1b4] ss:$8 sps:$4 sm:$0xff]  }
 0x1bd   :  { %v6484_v19 = vadd.f32 %v6295_v38, %v742_v29  ;;  %3798 = vmatpush1.bf16.msra.mxu0 %v5086_v22  ;;  %v648_v5 = vpop.f32.mrb[104].mxu1  ;;  %v7835_v2 = vld [vmem:[#allocation11_spill] sm:$0xff]  ;;  %v7839_v52 = vld [vmem:[#allocation12_spill] sm:$0xff]  ;;  %v7842_v44 = vld [vmem:[#allocation13_spill] sm:$0xff] }
 0x1be   :  { %v709_v21 = vmax.f32 %v7813_v20, %v648_v5  ;;  %v650_v4 = vpop.f32.mrb[105].mxu1  ;;  %3799 = vmatprep.subr.bf16.mxu0 %v5094_v58  ;;  %v5107_v20 = vld [vmem:[%s7713_s3 + $0x1a0] ss:$8 sps:$4 sm:$0xff]   ;;  %v7843_v31 = vld [vmem:[#allocation25_spill] sm:$0xff]  ;;  %v5121_v55 = vld [vmem:[%s7713_s3 + $0x1c4] ss:$8 sps:$4 sm:$0xff]  }
 0x1bf   :  { %v710_v30 = vmax.f32 %v7814_v61, %v650_v4  ;;  %3603 = vmatpush1.bf16.msra.mxu1 %v5089_v32  ;;  %v652_v8 = vpop.f32.mrb[106].mxu1  ;;  %v5112_v32 = vld [vmem:[%s7713_s3 + $0x664] ss:$8 sps:$4 sm:$0xff]  }
 0x1c0   :  { %v743_v40 = vmax.f32 %v7817_v1, %v709_v21  ;;  %v713_v49 = vmax.f32 %v7818_v45, %v652_v8  ;;  %v654_v10 = vpop.f32.mrb[107].mxu1  ;;  %3604 = vmatprep.subr.bf16.mxu1 %v5097_v59  ;;  %v7830_v59 = vld [vmem:[#allocation35_spill] sm:$0xff]  ;;  %v7831_v21 = vld [vmem:[#allocation10_spill] sm:$0xff] }
 0x1c1   :  { %v744_v39 = vmax.f32 %v7821_v12, %v710_v30  ;;  %v714_v16 = vmax.f32 %v7822_v0, %v654_v10  ;;  %3800 = vmatpush1.bf16.msra.mxu0 %v5092_v60  ;;  %v7832_v4 = vld [vmem:[#allocation22_spill] sm:$0xff]  ;;  %v7834_v30 = vld [vmem:[#allocation36_spill] sm:$0xff]  ;;  %v7836_v1 = vld [vmem:[#allocation23_spill] sm:$0xff] }
 0x1c2   :  { %v6512_v7 = vadd.f32 %v6291_v37, %v743_v40  ;;  %v745_v9 = vmax.f32 %v7825_v17, %v713_v49  ;;  %3801 = vmatprep.subr.bf16.mxu0 %v5100_v3  ;;  %v7833_v3 = vmax.f32 %v7831_v21, %v7832_v4  ;;  %v7837_v40 = vmax.f32 %v7835_v2, %v7836_v1  ;;  %v7838_v49 = vld [vmem:[#allocation37_spill] sm:$0xff]  ;;  %v7840_v12 = vld [vmem:[#allocation24_spill] sm:$0xff]  ;;  %v5145_v4 = vld [vmem:[%s7713_s3 + $0x204] ss:$8 sps:$4 sm:$0xff]  }
 0x1c3   :  { %v6521_v11 = vadd.f32 %v6295_v38, %v744_v39  ;;  %v746_v22 = vmax.f32 %v7828_v53, %v714_v16  ;;  %3605 = vmatpush1.bf16.msra.mxu1 %v5095_v25  ;;  %v7841_v39 = vmax.f32 %v7839_v52, %v7840_v12  ;;  %v5118_v16 = vld [vmem:[%s7713_s3 + $0x674] ss:$8 sps:$4 sm:$0xff]   ;;  %v7844_v17 = vmax.f32 %v7842_v44, %v7843_v31  ;;  %v5149_v1 = vld [vmem:[%s7713_s3 + $0x210] ss:$8 sps:$4 sm:$0xff]   ;;  %v5158_v52 = vld [vmem:[%s7713_s3 + $0x6e0] ss:$8 sps:$4 sm:$0xff]  }
 0x1c4   :  { %v6530_v47 = vadd.f32 %v6291_v37, %v745_v9  ;;  %3606 = vmatprep.subr.bf16.mxu1 %v5103_v50  ;;  %v5110_v50 = vld [vmem:[%s7713_s3 + $0x660] ss:$8 sps:$4 sm:$0xff]   ;;  %v793_v21 = vmax.f32 %v6312_v33, 0.0  ;;  %v5154_v2 = vld [vmem:[%s7713_s3 + $0x6d4] ss:$8 sps:$4 sm:$0xff]   ;;  %v803_v44 = vmax.f32 %v6410_v62, 0.0 }
 0x1c5   :  { %v6536_v56 = vadd.f32 %v6295_v38, %v746_v22  ;;  %3802 = vmatpush1.bf16.msra.mxu0 %v5098_v54  ;;  %v658_v58 = vpop.f32.mrb[108].mxu1  ;;  %v5116_v22 = vld [vmem:[%s7713_s3 + $0x670] ss:$8 sps:$4 sm:$0xff]   ;;  %v5143_v33 = vld [vmem:[%s7713_s3 + $0x200] ss:$8 sps:$4 sm:$0xff]  }
 0x1c6   :  { %v717_v26 = vmax.f32 %v7829_v27, %v658_v58  ;;  %v660_v29 = vpop.f32.mrb[109].mxu1  ;;  %3803 = vmatprep.subr.bf16.mxu0 %v5106_v34  ;;  %v5113_v34 = vld [vmem:[%s7713_s3 + $0x1b0] ss:$8 sps:$4 sm:$0xff]   ;;  %v5130_v58 = vld [vmem:[%s7713_s3 + $0x694] ss:$8 sps:$4 sm:$0xff]  }
 0x1c7   :  { %v718_v5 = vmax.f32 %v7830_v59, %v660_v29  ;;  %3607 = vmatpush1.bf16.msra.mxu1 %v5101_v57  ;;  %v662_v60 = vpop.f32.mrb[110].mxu1  ;;  %v5124_v57 = vld [vmem:[%s7713_s3 + $0x684] ss:$8 sps:$4 sm:$0xff]   ;;  %v5139_v59 = vld [vmem:[%s7713_s3 + $0x1f4] ss:$8 sps:$4 sm:$0xff]  }
 0x1c8   :  { %v747_v61 = vmax.f32 %v7833_v3, %v717_v26  ;;  %v721_v8 = vmax.f32 %v7834_v30, %v662_v60  ;;  %v664_v25 = vpop.f32.mrb[111].mxu1  ;;  %3608 = vmatprep.subr.bf16.mxu1 %v5109_v46  ;;  %v5122_v46 = vld [vmem:[%s7713_s3 + $0x680] ss:$8 sps:$4 sm:$0xff]   ;;  %v5133_v27 = vld [vmem:[%s7713_s3 + $0x1e4] ss:$8 sps:$4 sm:$0xff]  }
 0x1c9   :  { %v748_v45 = vmax.f32 %v7837_v40, %v718_v5  ;;  %v722_v10 = vmax.f32 %v7838_v49, %v664_v25  ;;  %3804 = vmatpush1.bf16.msra.mxu0 %v5104_v41  ;;  %v5125_v41 = vld [vmem:[%s7713_s3 + $0x1d0] ss:$8 sps:$4 sm:$0xff]   ;;  %v5136_v29 = vld [vmem:[%s7713_s3 + $0x6a4] ss:$8 sps:$4 sm:$0xff]   ;;  %v5134_v5 = vld [vmem:[%s7713_s3 + $0x6a0] ss:$8 sps:$4 sm:$0xff]  }
 0x1ca   :  { %v6564_v14 = vadd.f32 %v6291_v37, %v747_v61  ;;  %v749_v0 = vmax.f32 %v7841_v39, %v721_v8  ;;  %3805 = vmatprep.subr.bf16.mxu0 %v5112_v32  ;;  %v5128_v26 = vld [vmem:[%s7713_s3 + $0x690] ss:$8 sps:$4 sm:$0xff]   ;;  %v5131_v32 = vld [vmem:[%s7713_s3 + $0x1e0] ss:$8 sps:$4 sm:$0xff]   ;;  %v5142_v60 = vld [vmem:[%s7713_s3 + $0x6b4] ss:$8 sps:$4 sm:$0xff]   ;;  %v821_v8 = vpack.c.bf16 %v793_v21, %v793_v21 }
 0x1cb   :  { %v6573_v54 = vadd.f32 %v6295_v38, %v748_v45  ;;  %v750_v9 = vmax.f32 %v7844_v17, %v722_v10  ;;  %3609 = vmatpush1.bf16.msra.mxu1 %v5107_v20  ;;  %v5137_v20 = vld [vmem:[%s7713_s3 + $0x1f0] ss:$8 sps:$4 sm:$0xff]   ;;  %v796_v61 = vmax.f32 %v6337_v28, 0.0  ;;  %v5148_v30 = vld [vmem:[%s7713_s3 + $0x6c4] ss:$8 sps:$4 sm:$0xff]  }
 0x1cc   :  { %v6582_v48 = vadd.f32 %v6291_v37, %v749_v0  ;;  %3610 = vmatprep.subr.bf16.mxu1 %v5115_v18  ;;  %v5119_v37 = vld [vmem:[%s7713_s3 + $0x1c0] ss:$8 sps:$4 sm:$0xff]   ;;  %v5140_v3 = vld [vmem:[%s7713_s3 + $0x6b0] ss:$8 sps:$4 sm:$0xff]   ;;  %v5151_v25 = vld [vmem:[%s7713_s3 + $0x214] ss:$8 sps:$4 sm:$0xff]  }
 0x1cd   :  { %v6588_v53 = vadd.f32 %v6295_v38, %v750_v9  ;;  %3806 = vmatpush1.bf16.msra.mxu0 %v5110_v50  ;;  %v5127_v38 = vld [vmem:[%s7713_s3 + $0x1d4] ss:$8 sps:$4 sm:$0xff]   ;;  %v824_v18 = vpack.c.bf16 %v796_v61, %v796_v61  ;;  %v5146_v28 = vld [vmem:[%s7713_s3 + $0x6c0] ss:$8 sps:$4 sm:$0xff]   ;;  %v5157_v40 = vld [vmem:[%s7713_s3 + $0x224] ss:$8 sps:$4 sm:$0xff]  }
 0x1ce   :  { %3807 = vmatprep.subr.bf16.mxu0 %v5118_v16  ;;  %v5152_v45 = vld [vmem:[%s7713_s3 + $0x6d0] ss:$8 sps:$4 sm:$0xff]   ;;  %v5160_v49 = vld [vmem:[%s7713_s3 + $0x6e4] ss:$8 sps:$4 sm:$0xff]   ;;  %v5155_v10 = vld [vmem:[%s7713_s3 + $0x220] ss:$8 sps:$4 sm:$0xff]  }
 0x1cf   :  { %3611 = vmatpush1.bf16.msra.mxu1 %v5113_v34  ;;  %v5163_v50 = vld [vmem:[%s7713_s3 + $0x234] ss:$8 sps:$4 sm:$0xff]   ;;  %v5161_v39 = vld [vmem:[%s7713_s3 + $0x230] ss:$8 sps:$4 sm:$0xff]   ;;  %v5169_v0 = vld [vmem:[%s7713_s3 + $0x244] ss:$8 sps:$4 sm:$0xff]  }
 0x1d0   :  { %3612 = vmatprep.subr.bf16.mxu1 %v5121_v55  ;;  %v5166_v12 = vld [vmem:[%s7713_s3 + $0x6f4] ss:$8 sps:$4 sm:$0xff]   ;;  %v5164_v16 = vld [vmem:[%s7713_s3 + $0x6f0] ss:$8 sps:$4 sm:$0xff]   ;;  %v5172_v31 = vld [vmem:[%s7713_s3 + $0x704] ss:$8 sps:$4 sm:$0xff]   ;;  %v831_v55 = vpack.c.bf16 %v803_v44, %v803_v44 }
 0x1d1   :  { %3808 = vmatpush1.bf16.msra.mxu0 %v5116_v22  ;;  %v5167_v17 = vld [vmem:[%s7713_s3 + $0x240] ss:$8 sps:$4 sm:$0xff]   ;;  %v806_v9 = vmax.f32 %v6432_v63, 0.0  ;;  %v5175_v34 = vld [vmem:[%s7713_s3 + $0x254] ss:$8 sps:$4 sm:$0xff]  }
 0x1d2   :  { %3809 = vmatprep.subr.bf16.mxu0 %v5124_v57  ;;  %v5170_v62 = vld [vmem:[%s7713_s3 + $0x700] ss:$8 sps:$4 sm:$0xff]   ;;  %v5178_v22 = vld [vmem:[%s7713_s3 + $0x714] ss:$8 sps:$4 sm:$0xff]   ;;  %v5173_v63 = vld [vmem:[%s7713_s3 + $0x250] ss:$8 sps:$4 sm:$0xff]  }
 0x1d3   :  { %3613 = vmatpush1.bf16.msra.mxu1 %v5119_v37  ;;  %v834_v57 = vpack.c.bf16 %v806_v9, %v806_v9  ;;  %v5181_v37 = vld [vmem:[%s7713_s3 + $0x264] ss:$8 sps:$4 sm:$0xff]   ;;  %v5194_v21 = vld [vmem:[%s7713_s3 + $0x740] ss:$8 sps:$4 sm:$0xff]   ;;  %v5238_v9 = vld [vmem:[%s7713_s3 + $0x7b4] ss:$8 sps:$4 sm:$0xff]  }
 0x1d4   :  { %3614 = vmatprep.subr.bf16.mxu1 %v5127_v38  ;;  %v5176_v38 = vld [vmem:[%s7713_s3 + $0x710] ss:$8 sps:$4 sm:$0xff]   ;;  %v5205_v61 = vld [vmem:[%s7713_s3 + $0x2a4] ss:$8 sps:$4 sm:$0xff]   ;;  %v5227_v44 = vld [vmem:[%s7713_s3 + $0x2e0] ss:$8 sps:$4 sm:$0xff]  }
 0x1d5   :  { %3810 = vmatpush1.bf16.msra.mxu0 %v5122_v46  ;;  %v5184_v46 = vld [vmem:[%s7713_s3 + $0x724] ss:$8 sps:$4 sm:$0xff]  }
 0x1d6   :  { %3811 = vmatprep.subr.bf16.mxu0 %v5130_v58  ;;  %v5179_v58 = vld [vmem:[%s7713_s3 + $0x260] ss:$8 sps:$4 sm:$0xff]  }
 0x1d7   :  { %3615 = vmatpush1.bf16.msra.mxu1 %v5125_v41  ;;  %v5187_v41 = vld [vmem:[%s7713_s3 + $0x274] ss:$8 sps:$4 sm:$0xff]  }
 0x1d8   :  { %3616 = vmatprep.subr.bf16.mxu1 %v5133_v27  ;;  %v5182_v27 = vld [vmem:[%s7713_s3 + $0x720] ss:$8 sps:$4 sm:$0xff]  }
 0x1d9   :  { %3812 = vmatpush1.bf16.msra.mxu0 %v5128_v26  ;;  %v5190_v26 = vld [vmem:[%s7713_s3 + $0x734] ss:$8 sps:$4 sm:$0xff]  }
 0x1da   :  { %3813 = vmatprep.subr.bf16.mxu0 %v5136_v29  ;;  %v5185_v29 = vld [vmem:[%s7713_s3 + $0x270] ss:$8 sps:$4 sm:$0xff]  }
 0x1db   :  { %3617 = vmatpush1.bf16.msra.mxu1 %v5131_v32  ;;  %v5193_v32 = vld [vmem:[%s7713_s3 + $0x284] ss:$8 sps:$4 sm:$0xff]  }
 0x1dc   :  { %3618 = vmatprep.subr.bf16.mxu1 %v5139_v59  ;;  %v5188_v59 = vld [vmem:[%s7713_s3 + $0x730] ss:$8 sps:$4 sm:$0xff]  }
 0x1dd   :  { %3814 = vmatpush1.bf16.msra.mxu0 %v5134_v5  ;;  %v5196_v5 = vld [vmem:[%s7713_s3 + $0x744] ss:$8 sps:$4 sm:$0xff]  }
 0x1de   :  { %3815 = vmatprep.subr.bf16.mxu0 %v5142_v60  ;;  %v5191_v60 = vld [vmem:[%s7713_s3 + $0x280] ss:$8 sps:$4 sm:$0xff]  }
 0x1df   :  { %3619 = vmatpush1.bf16.msra.mxu1 %v5137_v20  ;;  %v5199_v20 = vld [vmem:[%s7713_s3 + $0x294] ss:$8 sps:$4 sm:$0xff]  }
 0x1e0   :  { %3629 = vmatprep.subr.bf16.mxu1 %v5145_v4  ;;  %v5202_v4 = vld [vmem:[%s7713_s3 + $0x754] ss:$8 sps:$4 sm:$0xff]  }
 0x1e1   :  { %3816 = vmatpush1.bf16.msra.mxu0 %v5140_v3  ;;  %v5197_v3 = vld [vmem:[%s7713_s3 + $0x290] ss:$8 sps:$4 sm:$0xff]  }
 0x1e2   :  { %3621 = vmatmul.mubr.bf16.vlgmr.msra.gmra.mrb[112].mxu1 %v821_v8  ;;  %3817 = vmatprep.subr.bf16.mxu0 %v5148_v30  ;;  %v5200_v30 = vld [vmem:[%s7713_s3 + $0x750] ss:$8 sps:$4 sm:$0xff]   ;;  %v5203_v8 = vld [vmem:[%s7713_s3 + $0x2a0] ss:$8 sps:$4 sm:$0xff]  }
 0x1e3   :  { %3630 = vmatpush1.bf16.msra.mxu1 %v5143_v33  ;;  %3661 = vmatprep.mubr.bf16.mxu1 %v824_v18  ;;  %v5208_v33 = vld [vmem:[%s7713_s3 + $0x764] ss:$8 sps:$4 sm:$0xff]   ;;  %v5206_v18 = vld [vmem:[%s7713_s3 + $0x760] ss:$8 sps:$4 sm:$0xff]  }
 0x1e4   :  { %3631 = vmatprep.subr.bf16.mxu1 %v5151_v25  ;;  %v5211_v25 = vld [vmem:[%s7713_s3 + $0x2b4] ss:$8 sps:$4 sm:$0xff]  }
 0x1e5   :  { %3818 = vmatpush1.bf16.msra.mxu0 %v5146_v28  ;;  %v5214_v28 = vld [vmem:[%s7713_s3 + $0x774] ss:$8 sps:$4 sm:$0xff]  }
 0x1e6   :  { %3819 = vmatprep.subr.bf16.mxu0 %v5154_v2  ;;  %v5209_v2 = vld [vmem:[%s7713_s3 + $0x2b0] ss:$8 sps:$4 sm:$0xff]  }
 0x1e7   :  { %3632 = vmatpush1.bf16.msra.mxu1 %v5149_v1  ;;  %v5217_v1 = vld [vmem:[%s7713_s3 + $0x2c4] ss:$8 sps:$4 sm:$0xff]  }
 0x1e8   :  { %3633 = vmatprep.subr.bf16.mxu1 %v5157_v40  ;;  %v5212_v40 = vld [vmem:[%s7713_s3 + $0x770] ss:$8 sps:$4 sm:$0xff]  }
 0x1e9   :  { %3820 = vmatpush1.bf16.msra.mxu0 %v5152_v45  ;;  %v5220_v45 = vld [vmem:[%s7713_s3 + $0x784] ss:$8 sps:$4 sm:$0xff]  }
 0x1ea   :  { %3821 = vmatprep.subr.bf16.mxu0 %v5160_v49  ;;  %v5215_v49 = vld [vmem:[%s7713_s3 + $0x2c0] ss:$8 sps:$4 sm:$0xff]  }
 0x1eb   :  { %3634 = vmatpush1.bf16.msra.mxu1 %v5155_v10  ;;  %v5223_v10 = vld [vmem:[%s7713_s3 + $0x2d4] ss:$8 sps:$4 sm:$0xff]  }
 0x1ec   :  { %3635 = vmatprep.subr.bf16.mxu1 %v5163_v50  ;;  %v5218_v50 = vld [vmem:[%s7713_s3 + $0x780] ss:$8 sps:$4 sm:$0xff]  }
 0x1ed   :  { %3822 = vmatpush1.bf16.msra.mxu0 %v5158_v52  ;;  %v5226_v52 = vld [vmem:[%s7713_s3 + $0x794] ss:$8 sps:$4 sm:$0xff]  }
 0x1ee   :  { %3823 = vmatprep.subr.bf16.mxu0 %v5166_v12  ;;  %v5221_v12 = vld [vmem:[%s7713_s3 + $0x2d0] ss:$8 sps:$4 sm:$0xff]  }
 0x1ef   :  { %3636 = vmatpush1.bf16.msra.mxu1 %v5161_v39  ;;  %v5229_v39 = vld [vmem:[%s7713_s3 + $0x2e4] ss:$8 sps:$4 sm:$0xff]  }
 0x1f0   :  { %3637 = vmatprep.subr.bf16.mxu1 %v5169_v0  ;;  %v5224_v0 = vld [vmem:[%s7713_s3 + $0x790] ss:$8 sps:$4 sm:$0xff]  }
 0x1f1   :  { %3824 = vmatpush1.bf16.msra.mxu0 %v5164_v16  ;;  %v5232_v16 = vld [vmem:[%s7713_s3 + $0x7a4] ss:$8 sps:$4 sm:$0xff]  }
 0x1f2   :  { %3834 = vmatprep.subr.bf16.mxu0 %v5172_v31  ;;  %v5235_v31 = vld [vmem:[%s7713_s3 + $0x2f4] ss:$8 sps:$4 sm:$0xff]  }
 0x1f3   :  { %3638 = vmatpush1.bf16.msra.mxu1 %v5167_v17  ;;  %v5230_v17 = vld [vmem:[%s7713_s3 + $0x7a0] ss:$8 sps:$4 sm:$0xff]  }
 0x1f4   :  { %3826 = vmatmul.mubr.bf16.vlgmr.msra.gmra.mrb[0].mxu0 %v831_v55  ;;  %3639 = vmatprep.subr.bf16.mxu1 %v5175_v34  ;;  %v5233_v34 = vld [vmem:[%s7713_s3 + $0x2f0] ss:$8 sps:$4 sm:$0xff]   ;;  %v5241_v55 = vld [vmem:[%s7713_s3 + $0x304] ss:$8 sps:$4 sm:$0xff]  }
 0x1f5   :  { %3835 = vmatpush1.bf16.msra.mxu0 %v5170_v62  ;;  %3866 = vmatprep.mubr.bf16.mxu0 %v834_v57  ;;  %v795_v62 = vmax.f32 %v6331_v24, 0.0  ;;  %v798_v57 = vmax.f32 %v6352_v36, 0.0  ;;  %v5239_v24 = vld [vmem:[%s7713_s3 + $0x300] ss:$8 sps:$4 sm:$0xff]  }
 0x1f6   :  { %3836 = vmatprep.subr.bf16.mxu0 %v5178_v22  ;;  %v5236_v22 = vld [vmem:[%s7713_s3 + $0x7b0] ss:$8 sps:$4 sm:$0xff]   ;;  %v5242_v36 = vld [vmem:[%s7713_s3 + $0x7c0] ss:$8 sps:$4 sm:$0xff]  }
 0x1f7   :  { %3640 = vmatpush1.bf16.msra.mxu1 %v5173_v63  ;;  %v5244_v63 = vld [vmem:[%s7713_s3 + $0x7c4] ss:$8 sps:$4 sm:$0xff]  }
 0x1f8   :  { %3641 = vmatprep.subr.bf16.mxu1 %v5181_v37  ;;  %v823_v37 = vpack.c.bf16 %v795_v62, %v795_v62  ;;  %v5296_v62 = vld [vmem:[%s7713_s3 + $0x850] ss:$8 sps:$4 sm:$0xff]  }
 0x1f9   :  { %3837 = vmatpush1.bf16.msra.mxu0 %v5176_v38  ;;  %v5247_v38 = vld [vmem:[%s7713_s3 + $0x314] ss:$8 sps:$4 sm:$0xff]  }
 0x1fa   :  { %3838 = vmatprep.subr.bf16.mxu0 %v5184_v46  ;;  %v826_v46 = vpack.c.bf16 %v798_v57, %v798_v57  ;;  %v5307_v57 = vld [vmem:[%s7713_s3 + $0x3b4] ss:$8 sps:$4 sm:$0xff]  }
 0x1fb   :  { %3642 = vmatpush1.bf16.msra.mxu1 %v5179_v58  ;;  %v5250_v58 = vld [vmem:[%s7713_s3 + $0x7d4] ss:$8 sps:$4 sm:$0xff]  }
 0x1fc   :  { %3643 = vmatprep.subr.bf16.mxu1 %v5187_v41  ;;  %v5245_v41 = vld [vmem:[%s7713_s3 + $0x310] ss:$8 sps:$4 sm:$0xff]  }
 0x1fd   :  { %3839 = vmatpush1.bf16.msra.mxu0 %v5182_v27  ;;  %v5253_v27 = vld [vmem:[%s7713_s3 + $0x324] ss:$8 sps:$4 sm:$0xff]  }
 0x1fe   :  { %3840 = vmatprep.subr.bf16.mxu0 %v5190_v26  ;;  %v5248_v26 = vld [vmem:[%s7713_s3 + $0x7d0] ss:$8 sps:$4 sm:$0xff]  }
 0x1ff   :  { %3644 = vmatpush1.bf16.msra.mxu1 %v5185_v29  ;;  %v5256_v29 = vld [vmem:[%s7713_s3 + $0x7e4] ss:$8 sps:$4 sm:$0xff]  }
 0x200   :  { %3645 = vmatprep.subr.bf16.mxu1 %v5193_v32  ;;  %v5251_v32 = vld [vmem:[%s7713_s3 + $0x320] ss:$8 sps:$4 sm:$0xff]  }
 0x201   :  { %3841 = vmatpush1.bf16.msra.mxu0 %v5188_v59  ;;  %v5259_v59 = vld [vmem:[%s7713_s3 + $0x334] ss:$8 sps:$4 sm:$0xff]  }
 0x202   :  { %3842 = vmatprep.subr.bf16.mxu0 %v5196_v5  ;;  %v5254_v5 = vld [vmem:[%s7713_s3 + $0x7e0] ss:$8 sps:$4 sm:$0xff]  }
 0x203   :  { %3646 = vmatpush1.bf16.msra.mxu1 %v5191_v60  ;;  %v5262_v60 = vld [vmem:[%s7713_s3 + $0x7f4] ss:$8 sps:$4 sm:$0xff]  }
 0x204   :  { %3647 = vmatprep.subr.bf16.mxu1 %v5199_v20  ;;  %v5257_v20 = vld [vmem:[%s7713_s3 + $0x330] ss:$8 sps:$4 sm:$0xff]  }
 0x205   :  { %3843 = vmatpush1.bf16.msra.mxu0 %v5194_v21  ;;  %v5265_v21 = vld [vmem:[%s7713_s3 + $0x344] ss:$8 sps:$4 sm:$0xff]  }
 0x206   :  { %3844 = vmatprep.subr.bf16.mxu0 %v5202_v4  ;;  %v5260_v4 = vld [vmem:[%s7713_s3 + $0x7f0] ss:$8 sps:$4 sm:$0xff]  }
 0x207   :  { %3648 = vmatpush1.bf16.msra.mxu1 %v5197_v3  ;;  %v805_v3 = vmax.f32 %v6426_v23, 0.0  ;;  %v5266_v23 = vld [vmem:[%s7713_s3 + $0x800] ss:$8 sps:$4 sm:$0xff]  }
 0x208   :  { %3649 = vmatprep.subr.bf16.mxu1 %v5205_v61  ;;  %v5268_v61 = vld [vmem:[%s7713_s3 + $0x804] ss:$8 sps:$4 sm:$0xff]  }
 0x209   :  { %3845 = vmatpush1.bf16.msra.mxu0 %v5200_v30  ;;  %v5263_v30 = vld [vmem:[%s7713_s3 + $0x340] ss:$8 sps:$4 sm:$0xff]  }
 0x20a   :  { %3846 = vmatprep.subr.bf16.mxu0 %v5208_v33  ;;  %v808_v33 = vmax.f32 %v6469_v6, 0.0  ;;  %v5269_v6 = vld [vmem:[%s7713_s3 + $0x350] ss:$8 sps:$4 sm:$0xff]  }
 0x20b   :  { %3650 = vmatpush1.bf16.msra.mxu1 %v5203_v8  ;;  %v5271_v8 = vld [vmem:[%s7713_s3 + $0x354] ss:$8 sps:$4 sm:$0xff]  }
 0x20c   :  { %3651 = vmatprep.subr.bf16.mxu1 %v5211_v25  ;;  %v833_v25 = vpack.c.bf16 %v805_v3, %v805_v3  ;;  %v5329_v3 = vld [vmem:[%s7713_s3 + $0x3f0] ss:$8 sps:$4 sm:$0xff]  }
 0x20d   :  { %3847 = vmatpush1.bf16.msra.mxu0 %v5206_v18  ;;  %v5274_v18 = vld [vmem:[%s7713_s3 + $0x814] ss:$8 sps:$4 sm:$0xff]  }
 0x20e   :  { %3848 = vmatprep.subr.bf16.mxu0 %v5214_v28  ;;  %v836_v28 = vpack.c.bf16 %v808_v33, %v808_v33  ;;  %v5332_v33 = vld [vmem:[%s7713_s3 + $0x8b0] ss:$8 sps:$4 sm:$0xff]  }
 0x20f   :  { %3652 = vmatpush1.bf16.msra.mxu1 %v5209_v2  ;;  %v5277_v2 = vld [vmem:[%s7713_s3 + $0x364] ss:$8 sps:$4 sm:$0xff]  }
 0x210   :  { %3653 = vmatprep.subr.bf16.mxu1 %v5217_v1  ;;  %v5272_v1 = vld [vmem:[%s7713_s3 + $0x810] ss:$8 sps:$4 sm:$0xff]  }
 0x211   :  { %3849 = vmatpush1.bf16.msra.mxu0 %v5212_v40  ;;  %v5280_v40 = vld [vmem:[%s7713_s3 + $0x824] ss:$8 sps:$4 sm:$0xff]  }
 0x212   :  { %3850 = vmatprep.subr.bf16.mxu0 %v5220_v45  ;;  %v5275_v45 = vld [vmem:[%s7713_s3 + $0x360] ss:$8 sps:$4 sm:$0xff]  }
 0x213   :  { %3654 = vmatpush1.bf16.msra.mxu1 %v5215_v49  ;;  %v5283_v49 = vld [vmem:[%s7713_s3 + $0x374] ss:$8 sps:$4 sm:$0xff]  }
 0x214   :  { %3655 = vmatprep.subr.bf16.mxu1 %v5223_v10  ;;  %v5278_v10 = vld [vmem:[%s7713_s3 + $0x820] ss:$8 sps:$4 sm:$0xff]  }
 0x215   :  { %3851 = vmatpush1.bf16.msra.mxu0 %v5218_v50  ;;  %v5286_v50 = vld [vmem:[%s7713_s3 + $0x834] ss:$8 sps:$4 sm:$0xff]  }
 0x216   :  { %3852 = vmatprep.subr.bf16.mxu0 %v5226_v52  ;;  %v5281_v52 = vld [vmem:[%s7713_s3 + $0x370] ss:$8 sps:$4 sm:$0xff]  }
 0x217   :  { %3656 = vmatpush1.bf16.msra.mxu1 %v5221_v12  ;;  %v5289_v12 = vld [vmem:[%s7713_s3 + $0x384] ss:$8 sps:$4 sm:$0xff]  }
 0x218   :  { %3657 = vmatprep.subr.bf16.mxu1 %v5229_v39  ;;  %v5284_v39 = vld [vmem:[%s7713_s3 + $0x830] ss:$8 sps:$4 sm:$0xff]  }
 0x219   :  { %3853 = vmatpush1.bf16.msra.mxu0 %v5224_v0  ;;  %v5292_v0 = vld [vmem:[%s7713_s3 + $0x844] ss:$8 sps:$4 sm:$0xff]  }
 0x21a   :  { %3854 = vmatprep.subr.bf16.mxu0 %v5232_v16  ;;  %v5287_v16 = vld [vmem:[%s7713_s3 + $0x380] ss:$8 sps:$4 sm:$0xff]  }
 0x21b   :  { %3658 = vmatpush1.bf16.msra.mxu1 %v5227_v44  ;;  %v5295_v44 = vld [vmem:[%s7713_s3 + $0x394] ss:$8 sps:$4 sm:$0xff]  }
 0x21c   :  { %3659 = vmatprep.subr.bf16.mxu1 %v5235_v31  ;;  %v5290_v31 = vld [vmem:[%s7713_s3 + $0x840] ss:$8 sps:$4 sm:$0xff]  }
 0x21d   :  { %3855 = vmatpush1.bf16.msra.mxu0 %v5230_v17  ;;  %v5298_v17 = vld [vmem:[%s7713_s3 + $0x854] ss:$8 sps:$4 sm:$0xff]  }
 0x21e   :  { %3856 = vmatprep.subr.bf16.mxu0 %v5238_v9  ;;  %v5293_v9 = vld [vmem:[%s7713_s3 + $0x390] ss:$8 sps:$4 sm:$0xff]  }
 0x21f   :  { %3660 = vmatpush1.bf16.msra.mxu1 %v5233_v34  ;;  %v5301_v34 = vld [vmem:[%s7713_s3 + $0x3a4] ss:$8 sps:$4 sm:$0xff]  }
 0x220   :  { %3670 = vmatprep.subr.bf16.mxu1 %v5241_v55  ;;  %v5304_v55 = vld [vmem:[%s7713_s3 + $0x864] ss:$8 sps:$4 sm:$0xff]  }
 0x221   :  { %3857 = vmatpush1.bf16.msra.mxu0 %v5236_v22  ;;  %v5299_v22 = vld [vmem:[%s7713_s3 + $0x3a0] ss:$8 sps:$4 sm:$0xff]  }
 0x222   :  { %3662 = vmatmul.mubr.bf16.vlgmr.msra.gmra.mrb[112].mxu1 %v823_v37  ;;  %3858 = vmatprep.subr.bf16.mxu0 %v5244_v63  ;;  %v5302_v63 = vld [vmem:[%s7713_s3 + $0x860] ss:$8 sps:$4 sm:$0xff]   ;;  %v5305_v37 = vld [vmem:[%s7713_s3 + $0x3b0] ss:$8 sps:$4 sm:$0xff]  }
 0x223   :  { %3671 = vmatpush1.bf16.msra.mxu1 %v5239_v24  ;;  %3702 = vmatprep.mubr.bf16.mxu1 %v826_v46  ;;  %v5310_v24 = vld [vmem:[%s7713_s3 + $0x874] ss:$8 sps:$4 sm:$0xff]   ;;  %v5308_v46 = vld [vmem:[%s7713_s3 + $0x870] ss:$8 sps:$4 sm:$0xff]  }
 0x224   :  { %3672 = vmatprep.subr.bf16.mxu1 %v5247_v38  ;;  %v5313_v38 = vld [vmem:[%s7713_s3 + $0x3c4] ss:$8 sps:$4 sm:$0xff]  }
 0x225   :  { %3859 = vmatpush1.bf16.msra.mxu0 %v5242_v36  ;;  %v5316_v36 = vld [vmem:[%s7713_s3 + $0x884] ss:$8 sps:$4 sm:$0xff]  }
 0x226   :  { %3860 = vmatprep.subr.bf16.mxu0 %v5250_v58  ;;  %v5311_v58 = vld [vmem:[%s7713_s3 + $0x3c0] ss:$8 sps:$4 sm:$0xff]  }
 0x227   :  { %3673 = vmatpush1.bf16.msra.mxu1 %v5245_v41  ;;  %v5319_v41 = vld [vmem:[%s7713_s3 + $0x3d4] ss:$8 sps:$4 sm:$0xff]  }
 0x228   :  { %3674 = vmatprep.subr.bf16.mxu1 %v5253_v27  ;;  %v5314_v27 = vld [vmem:[%s7713_s3 + $0x880] ss:$8 sps:$4 sm:$0xff]  }
 0x229   :  { %3861 = vmatpush1.bf16.msra.mxu0 %v5248_v26  ;;  %v5322_v26 = vld [vmem:[%s7713_s3 + $0x894] ss:$8 sps:$4 sm:$0xff]  }
 0x22a   :  { %3862 = vmatprep.subr.bf16.mxu0 %v5256_v29  ;;  %v5317_v29 = vld [vmem:[%s7713_s3 + $0x3d0] ss:$8 sps:$4 sm:$0xff]  }
 0x22b   :  { %3675 = vmatpush1.bf16.msra.mxu1 %v5251_v32  ;;  %v5325_v32 = vld [vmem:[%s7713_s3 + $0x3e4] ss:$8 sps:$4 sm:$0xff]  }
 0x22c   :  { %3676 = vmatprep.subr.bf16.mxu1 %v5259_v59  ;;  %v5320_v59 = vld [vmem:[%s7713_s3 + $0x890] ss:$8 sps:$4 sm:$0xff]  }
 0x22d   :  { %3863 = vmatpush1.bf16.msra.mxu0 %v5254_v5  ;;  %v5328_v5 = vld [vmem:[%s7713_s3 + $0x8a4] ss:$8 sps:$4 sm:$0xff]  }
 0x22e   :  { %3864 = vmatprep.subr.bf16.mxu0 %v5262_v60  ;;  %v5323_v60 = vld [vmem:[%s7713_s3 + $0x3e0] ss:$8 sps:$4 sm:$0xff]  }
 0x22f   :  { %3677 = vmatpush1.bf16.msra.mxu1 %v5257_v20  ;;  %v5331_v20 = vld [vmem:[%s7713_s3 + $0x3f4] ss:$8 sps:$4 sm:$0xff]  }
 0x230   :  { %3678 = vmatprep.subr.bf16.mxu1 %v5265_v21  ;;  %v5326_v21 = vld [vmem:[%s7713_s3 + $0x8a0] ss:$8 sps:$4 sm:$0xff]  }
 0x231   :  { %3865 = vmatpush1.bf16.msra.mxu0 %v5260_v4  ;;  %v5334_v4 = vld [vmem:[%s7713_s3 + $0x8b4] ss:$8 sps:$4 sm:$0xff]  }
 0x232   :  { %3875 = vmatprep.subr.bf16.mxu0 %v5268_v61  ;;  %v797_v61 = vmax.f32 %v6346_v42, 0.0  ;;  %v5335_v42 = vld [vmem:[%s7713_s3 + $0x400] ss:$8 sps:$4 sm:$0xff]  }
 0x233   :  { %3679 = vmatpush1.bf16.msra.mxu1 %v5263_v30  ;;  %v5337_v30 = vld [vmem:[%s7713_s3 + $0x404] ss:$8 sps:$4 sm:$0xff]  }
 0x234   :  { %3867 = vmatmul.mubr.bf16.vlgmr.msra.gmra.mrb[0].mxu0 %v833_v25  ;;  %3680 = vmatprep.subr.bf16.mxu1 %v5271_v8  ;;  %v800_v8 = vmax.f32 %v6377_v15, 0.0  ;;  %v825_v25 = vpack.c.bf16 %v797_v61, %v797_v61  ;;  %v5338_v15 = vld [vmem:[%s7713_s3 + $0x8c0] ss:$8 sps:$4 sm:$0xff]  }
 0x235   :  { %3876 = vmatpush1.bf16.msra.mxu0 %v5266_v23  ;;  %3907 = vmatprep.mubr.bf16.mxu0 %v836_v28  ;;  %v5340_v23 = vld [vmem:[%s7713_s3 + $0x8c4] ss:$8 sps:$4 sm:$0xff]   ;;  %v5398_v61 = vld [vmem:[%s7713_s3 + $0x960] ss:$8 sps:$4 sm:$0xff]  }
 0x236   :  { %3877 = vmatprep.subr.bf16.mxu0 %v5274_v18  ;;  %v5343_v18 = vld [vmem:[%s7713_s3 + $0x414] ss:$8 sps:$4 sm:$0xff]   ;;  %v828_v28 = vpack.c.bf16 %v800_v8, %v800_v8  ;;  %v5409_v8 = vld [vmem:[%s7713_s3 + $0x4c4] ss:$8 sps:$4 sm:$0xff]  }
 0x237   :  { %3681 = vmatpush1.bf16.msra.mxu1 %v5269_v6  ;;  %v5346_v6 = vld [vmem:[%s7713_s3 + $0x8d4] ss:$8 sps:$4 sm:$0xff]  }
 0x238   :  { %3682 = vmatprep.subr.bf16.mxu1 %v5277_v2  ;;  %v5341_v2 = vld [vmem:[%s7713_s3 + $0x410] ss:$8 sps:$4 sm:$0xff]  }
 0x239   :  { %3878 = vmatpush1.bf16.msra.mxu0 %v5272_v1  ;;  %v5349_v1 = vld [vmem:[%s7713_s3 + $0x424] ss:$8 sps:$4 sm:$0xff]  }
 0x23a   :  { %3879 = vmatprep.subr.bf16.mxu0 %v5280_v40  ;;  %v5344_v40 = vld [vmem:[%s7713_s3 + $0x8d0] ss:$8 sps:$4 sm:$0xff]  }
 0x23b   :  { %3683 = vmatpush1.bf16.msra.mxu1 %v5275_v45  ;;  %v5352_v45 = vld [vmem:[%s7713_s3 + $0x8e4] ss:$8 sps:$4 sm:$0xff]  }
 0x23c   :  { %3684 = vmatprep.subr.bf16.mxu1 %v5283_v49  ;;  %v5347_v49 = vld [vmem:[%s7713_s3 + $0x420] ss:$8 sps:$4 sm:$0xff]  }
 0x23d   :  { %3880 = vmatpush1.bf16.msra.mxu0 %v5278_v10  ;;  %v5355_v10 = vld [vmem:[%s7713_s3 + $0x434] ss:$8 sps:$4 sm:$0xff]  }
 0x23e   :  { %3881 = vmatprep.subr.bf16.mxu0 %v5286_v50  ;;  %v5350_v50 = vld [vmem:[%s7713_s3 + $0x8e0] ss:$8 sps:$4 sm:$0xff]  }
 0x23f   :  { %3685 = vmatpush1.bf16.msra.mxu1 %v5281_v52  ;;  %v5358_v52 = vld [vmem:[%s7713_s3 + $0x8f4] ss:$8 sps:$4 sm:$0xff]  }
 0x240   :  { %3686 = vmatprep.subr.bf16.mxu1 %v5289_v12  ;;  %v5353_v12 = vld [vmem:[%s7713_s3 + $0x430] ss:$8 sps:$4 sm:$0xff]  }
 0x241   :  { %3882 = vmatpush1.bf16.msra.mxu0 %v5284_v39  ;;  %v5361_v39 = vld [vmem:[%s7713_s3 + $0x444] ss:$8 sps:$4 sm:$0xff]  }
 0x242   :  { %3883 = vmatprep.subr.bf16.mxu0 %v5292_v0  ;;  %v5356_v0 = vld [vmem:[%s7713_s3 + $0x8f0] ss:$8 sps:$4 sm:$0xff]  }
 0x243   :  { %3687 = vmatpush1.bf16.msra.mxu1 %v5287_v16  ;;  %v807_v16 = vmax.f32 %v6460_v13, 0.0  ;;  %v5362_v13 = vld [vmem:[%s7713_s3 + $0x900] ss:$8 sps:$4 sm:$0xff]  }
 0x244   :  { %3688 = vmatprep.subr.bf16.mxu1 %v5295_v44  ;;  %v5364_v44 = vld [vmem:[%s7713_s3 + $0x904] ss:$8 sps:$4 sm:$0xff]  }
 0x245   :  { %3884 = vmatpush1.bf16.msra.mxu0 %v5290_v31  ;;  %v5359_v31 = vld [vmem:[%s7713_s3 + $0x440] ss:$8 sps:$4 sm:$0xff]  }
 0x246   :  { %3885 = vmatprep.subr.bf16.mxu0 %v5298_v17  ;;  %v810_v17 = vmax.f32 %v6484_v19, 0.0  ;;  %v5365_v19 = vld [vmem:[%s7713_s3 + $0x450] ss:$8 sps:$4 sm:$0xff]  }
 0x247   :  { %3689 = vmatpush1.bf16.msra.mxu1 %v5293_v9  ;;  %v5367_v9 = vld [vmem:[%s7713_s3 + $0x454] ss:$8 sps:$4 sm:$0xff]  }
 0x248   :  { %3690 = vmatprep.subr.bf16.mxu1 %v5301_v34  ;;  %v835_v34 = vpack.c.bf16 %v807_v16, %v807_v16 }
 0x249   :  { %3886 = vmatpush1.bf16.msra.mxu0 %v5296_v62  ;;  %v5370_v62 = vld [vmem:[%s7713_s3 + $0x914] ss:$8 sps:$4 sm:$0xff]  }
 0x24a   :  { %3887 = vmatprep.subr.bf16.mxu0 %v5304_v55  ;;  %v838_v55 = vpack.c.bf16 %v810_v17, %v810_v17  ;;  %v5439_v17 = vld [vmem:[%s7713_s3 + $0x9e4] ss:$8 sps:$4 sm:$0xff]  }
 0x24b   :  { %3691 = vmatpush1.bf16.msra.mxu1 %v5299_v22  ;;  %v5373_v22 = vld [vmem:[%s7713_s3 + $0x464] ss:$8 sps:$4 sm:$0xff]  }
 0x24c   :  { %3692 = vmatprep.subr.bf16.mxu1 %v5307_v57  ;;  %v5368_v57 = vld [vmem:[%s7713_s3 + $0x910] ss:$8 sps:$4 sm:$0xff]  }
 0x24d   :  { %3888 = vmatpush1.bf16.msra.mxu0 %v5302_v63  ;;  %v5376_v63 = vld [vmem:[%s7713_s3 + $0x924] ss:$8 sps:$4 sm:$0xff]  }
 0x24e   :  { %3889 = vmatprep.subr.bf16.mxu0 %v5310_v24  ;;  %v5371_v24 = vld [vmem:[%s7713_s3 + $0x460] ss:$8 sps:$4 sm:$0xff]  }
 0x24f   :  { %3693 = vmatpush1.bf16.msra.mxu1 %v5305_v37  ;;  %v5379_v37 = vld [vmem:[%s7713_s3 + $0x474] ss:$8 sps:$4 sm:$0xff]  }
 0x250   :  { %3694 = vmatprep.subr.bf16.mxu1 %v5313_v38  ;;  %v5374_v38 = vld [vmem:[%s7713_s3 + $0x920] ss:$8 sps:$4 sm:$0xff]  }
 0x251   :  { %3890 = vmatpush1.bf16.msra.mxu0 %v5308_v46  ;;  %v5382_v46 = vld [vmem:[%s7713_s3 + $0x934] ss:$8 sps:$4 sm:$0xff]  }
 0x252   :  { %3891 = vmatprep.subr.bf16.mxu0 %v5316_v36  ;;  %v5377_v36 = vld [vmem:[%s7713_s3 + $0x470] ss:$8 sps:$4 sm:$0xff]  }
 0x253   :  { %3695 = vmatpush1.bf16.msra.mxu1 %v5311_v58  ;;  %v5385_v58 = vld [vmem:[%s7713_s3 + $0x484] ss:$8 sps:$4 sm:$0xff]  }
 0x254   :  { %3696 = vmatprep.subr.bf16.mxu1 %v5319_v41  ;;  %v5380_v41 = vld [vmem:[%s7713_s3 + $0x930] ss:$8 sps:$4 sm:$0xff]  }
 0x255   :  { %3892 = vmatpush1.bf16.msra.mxu0 %v5314_v27  ;;  %v5388_v27 = vld [vmem:[%s7713_s3 + $0x944] ss:$8 sps:$4 sm:$0xff]  }
 0x256   :  { %3893 = vmatprep.subr.bf16.mxu0 %v5322_v26  ;;  %v5383_v26 = vld [vmem:[%s7713_s3 + $0x480] ss:$8 sps:$4 sm:$0xff]  }
 0x257   :  { %3697 = vmatpush1.bf16.msra.mxu1 %v5317_v29  ;;  %v5391_v29 = vld [vmem:[%s7713_s3 + $0x494] ss:$8 sps:$4 sm:$0xff]  }
 0x258   :  { %3698 = vmatprep.subr.bf16.mxu1 %v5325_v32  ;;  %v5386_v32 = vld [vmem:[%s7713_s3 + $0x940] ss:$8 sps:$4 sm:$0xff]  }
 0x259   :  { %3894 = vmatpush1.bf16.msra.mxu0 %v5320_v59  ;;  %v5394_v59 = vld [vmem:[%s7713_s3 + $0x954] ss:$8 sps:$4 sm:$0xff]  }
 0x25a   :  { %3895 = vmatprep.subr.bf16.mxu0 %v5328_v5  ;;  %v5389_v5 = vld [vmem:[%s7713_s3 + $0x490] ss:$8 sps:$4 sm:$0xff]  }
 0x25b   :  { %3699 = vmatpush1.bf16.msra.mxu1 %v5323_v60  ;;  %v5397_v60 = vld [vmem:[%s7713_s3 + $0x4a4] ss:$8 sps:$4 sm:$0xff]  }
 0x25c   :  { %3700 = vmatprep.subr.bf16.mxu1 %v5331_v20  ;;  %v5392_v20 = vld [vmem:[%s7713_s3 + $0x950] ss:$8 sps:$4 sm:$0xff]  }
 0x25d   :  { %3896 = vmatpush1.bf16.msra.mxu0 %v5326_v21  ;;  %v5400_v21 = vld [vmem:[%s7713_s3 + $0x964] ss:$8 sps:$4 sm:$0xff]  }
 0x25e   :  { %3897 = vmatprep.subr.bf16.mxu0 %v5334_v4  ;;  %v5395_v4 = vld [vmem:[%s7713_s3 + $0x4a0] ss:$8 sps:$4 sm:$0xff]  }
 0x25f   :  { %3701 = vmatpush1.bf16.msra.mxu1 %v5329_v3  ;;  %v5403_v3 = vld [vmem:[%s7713_s3 + $0x4b4] ss:$8 sps:$4 sm:$0xff]  }
 0x260   :  { %3711 = vmatprep.subr.bf16.mxu1 %v5337_v30  ;;  %v5406_v30 = vld [vmem:[%s7713_s3 + $0x974] ss:$8 sps:$4 sm:$0xff]  }
 0x261   :  { %3898 = vmatpush1.bf16.msra.mxu0 %v5332_v33  ;;  %v5401_v33 = vld [vmem:[%s7713_s3 + $0x4b0] ss:$8 sps:$4 sm:$0xff]  }
 0x262   :  { %3703 = vmatmul.mubr.bf16.vlgmr.msra.gmra.mrb[112].mxu1 %v825_v25  ;;  %3899 = vmatprep.subr.bf16.mxu0 %v5340_v23  ;;  %v5404_v23 = vld [vmem:[%s7713_s3 + $0x970] ss:$8 sps:$4 sm:$0xff]   ;;  %v5407_v25 = vld [vmem:[%s7713_s3 + $0x4c0] ss:$8 sps:$4 sm:$0xff]  }
 0x263   :  { %3712 = vmatpush1.bf16.msra.mxu1 %v5335_v42  ;;  %3743 = vmatprep.mubr.bf16.mxu1 %v828_v28  ;;  %v5412_v42 = vld [vmem:[%s7713_s3 + $0x984] ss:$8 sps:$4 sm:$0xff]   ;;  %v5410_v28 = vld [vmem:[%s7713_s3 + $0x980] ss:$8 sps:$4 sm:$0xff]  }
 0x264   :  { %3713 = vmatprep.subr.bf16.mxu1 %v5343_v18  ;;  %v5415_v18 = vld [vmem:[%s7713_s3 + $0x4d4] ss:$8 sps:$4 sm:$0xff]  }
 0x265   :  { %3900 = vmatpush1.bf16.msra.mxu0 %v5338_v15  ;;  %v5418_v15 = vld [vmem:[%s7713_s3 + $0x994] ss:$8 sps:$4 sm:$0xff]  }
 0x266   :  { %3901 = vmatprep.subr.bf16.mxu0 %v5346_v6  ;;  %v5413_v6 = vld [vmem:[%s7713_s3 + $0x4d0] ss:$8 sps:$4 sm:$0xff]  }
 0x267   :  { %3714 = vmatpush1.bf16.msra.mxu1 %v5341_v2  ;;  %v5421_v2 = vld [vmem:[%s7713_s3 + $0x4e4] ss:$8 sps:$4 sm:$0xff]  }
 0x268   :  { %3715 = vmatprep.subr.bf16.mxu1 %v5349_v1  ;;  %v5416_v1 = vld [vmem:[%s7713_s3 + $0x990] ss:$8 sps:$4 sm:$0xff]  }
 0x269   :  { %3902 = vmatpush1.bf16.msra.mxu0 %v5344_v40  ;;  %v5424_v40 = vld [vmem:[%s7713_s3 + $0x9a4] ss:$8 sps:$4 sm:$0xff]  }
 0x26a   :  { %3903 = vmatprep.subr.bf16.mxu0 %v5352_v45  ;;  %v5419_v45 = vld [vmem:[%s7713_s3 + $0x4e0] ss:$8 sps:$4 sm:$0xff]  }
 0x26b   :  { %3716 = vmatpush1.bf16.msra.mxu1 %v5347_v49  ;;  %v5427_v49 = vld [vmem:[%s7713_s3 + $0x4f4] ss:$8 sps:$4 sm:$0xff]  }
 0x26c   :  { %3717 = vmatprep.subr.bf16.mxu1 %v5355_v10  ;;  %v5422_v10 = vld [vmem:[%s7713_s3 + $0x9a0] ss:$8 sps:$4 sm:$0xff]  }
 0x26d   :  { %3904 = vmatpush1.bf16.msra.mxu0 %v5350_v50  ;;  %v5430_v50 = vld [vmem:[%s7713_s3 + $0x9b4] ss:$8 sps:$4 sm:$0xff]  }
 0x26e   :  { %3905 = vmatprep.subr.bf16.mxu0 %v5358_v52  ;;  %v5425_v52 = vld [vmem:[%s7713_s3 + $0x4f0] ss:$8 sps:$4 sm:$0xff]  }
 0x26f   :  { %3718 = vmatpush1.bf16.msra.mxu1 %v5353_v12  ;;  %v799_v12 = vmax.f32 %v6371_v51, 0.0  ;;  %v5436_v51 = vld [vmem:[%s7713_s3 + $0x9d4] ss:$8 sps:$4 sm:$0xff]  }
 0x270   :  { %3719 = vmatprep.subr.bf16.mxu1 %v5361_v39  ;;  %v5428_v39 = vld [vmem:[%s7713_s3 + $0x9b0] ss:$8 sps:$4 sm:$0xff]  }
 0x271   :  { %3906 = vmatpush1.bf16.msra.mxu0 %v5356_v0  ;;  %v5433_v0 = vld [vmem:[%s7713_s3 + $0x9c4] ss:$8 sps:$4 sm:$0xff]   ;;  %v827_v16 = vpack.c.bf16 %v799_v12, %v799_v12  ;;  %v5500_v12 = vld [vmem:[%s7713_s3 + $0xb30] ss:$8 sps:$4 sm:$0xff]  }
 0x272   :  { %3916 = vmatprep.subr.bf16.mxu0 %v5364_v44  ;;  %v5431_v44 = vld [vmem:[%s7713_s3 + $0x9c0] ss:$8 sps:$4 sm:$0xff]  }
 0x273   :  { %3720 = vmatpush1.bf16.msra.mxu1 %v5359_v31  ;;  %v5434_v31 = vld [vmem:[%s7713_s3 + $0x9d0] ss:$8 sps:$4 sm:$0xff]  }
 0x274   :  { %3908 = vmatmul.mubr.bf16.vlgmr.msra.gmra.mrb[0].mxu0 %v835_v34  ;;  %3721 = vmatprep.subr.bf16.mxu1 %v5367_v9  ;;  %v5437_v9 = vld [vmem:[%s7713_s3 + $0x9e0] ss:$8 sps:$4 sm:$0xff]   ;;  %v5440_v34 = vld [vmem:[%s7713_s3 + $0x9f0] ss:$8 sps:$4 sm:$0xff]  }
 0x275   :  { %3917 = vmatpush1.bf16.msra.mxu0 %v5362_v13  ;;  %3948 = vmatprep.mubr.bf16.mxu0 %v838_v55  ;;  %v5442_v13 = vld [vmem:[%s7713_s3 + $0x9f4] ss:$8 sps:$4 sm:$0xff]   ;;  %v5445_v55 = vld [vmem:[%s7713_s3 + $0xa04] ss:$8 sps:$4 sm:$0xff]  }
 0x276   :  { %3918 = vmatprep.subr.bf16.mxu0 %v5370_v62  ;;  %v809_v62 = vmax.f32 %v6478_v43, 0.0  ;;  %v5446_v43 = vld [vmem:[%s7713_s3 + $0xa10] ss:$8 sps:$4 sm:$0xff]  }
 0x277   :  { %3722 = vmatpush1.bf16.msra.mxu1 %v5365_v19  ;;  %v812_v19 = vmax.f32 %v6521_v11, 0.0  ;;  %v5451_v11 = vld [vmem:[%s7713_s3 + $0xa24] ss:$8 sps:$4 sm:$0xff]  }
 0x278   :  { %3723 = vmatprep.subr.bf16.mxu1 %v5373_v22  ;;  %v5443_v22 = vld [vmem:[%s7713_s3 + $0xa00] ss:$8 sps:$4 sm:$0xff]  }
 0x279   :  { %3919 = vmatpush1.bf16.msra.mxu0 %v5368_v57  ;;  %v837_v57 = vpack.c.bf16 %v809_v62, %v809_v62  ;;  %v5520_v62 = vld [vmem:[%s7713_s3 + $0xb94] ss:$8 sps:$4 sm:$0xff]  }
 0x27a   :  { %3920 = vmatprep.subr.bf16.mxu0 %v5376_v63  ;;  %v5448_v63 = vld [vmem:[%s7713_s3 + $0xa14] ss:$8 sps:$4 sm:$0xff]  }
 0x27b   :  { %3724 = vmatpush1.bf16.msra.mxu1 %v5371_v24  ;;  %v840_v24 = vpack.c.bf16 %v812_v19, %v812_v19  ;;  %v5523_v19 = vld [vmem:[%s7713_s3 + $0xba4] ss:$8 sps:$4 sm:$0xff]  }
 0x27c   :  { %3725 = vmatprep.subr.bf16.mxu1 %v5379_v37  ;;  %v5449_v37 = vld [vmem:[%s7713_s3 + $0xa20] ss:$8 sps:$4 sm:$0xff]  }
 0x27d   :  { %3921 = vmatpush1.bf16.msra.mxu0 %v5374_v38  ;;  %v5454_v38 = vld [vmem:[%s7713_s3 + $0xa34] ss:$8 sps:$4 sm:$0xff]  }
 0x27e   :  { %3922 = vmatprep.subr.bf16.mxu0 %v5382_v46  ;;  %v5452_v46 = vld [vmem:[%s7713_s3 + $0xa30] ss:$8 sps:$4 sm:$0xff]  }
 0x27f   :  { %3726 = vmatpush1.bf16.msra.mxu1 %v5377_v36  ;;  %v5457_v36 = vld [vmem:[%s7713_s3 + $0xa44] ss:$8 sps:$4 sm:$0xff]  }
 0x280   :  { %3727 = vmatprep.subr.bf16.mxu1 %v5385_v58  ;;  %v5455_v58 = vld [vmem:[%s7713_s3 + $0xa40] ss:$8 sps:$4 sm:$0xff]  }
 0x281   :  { %3923 = vmatpush1.bf16.msra.mxu0 %v5380_v41  ;;  %v5460_v41 = vld [vmem:[%s7713_s3 + $0xa54] ss:$8 sps:$4 sm:$0xff]  }
 0x282   :  { %3924 = vmatprep.subr.bf16.mxu0 %v5388_v27  ;;  %v5458_v27 = vld [vmem:[%s7713_s3 + $0xa50] ss:$8 sps:$4 sm:$0xff]  }
 0x283   :  { %3728 = vmatpush1.bf16.msra.mxu1 %v5383_v26  ;;  %v5463_v26 = vld [vmem:[%s7713_s3 + $0xa64] ss:$8 sps:$4 sm:$0xff]  }
 0x284   :  { %3729 = vmatprep.subr.bf16.mxu1 %v5391_v29  ;;  %v5461_v29 = vld [vmem:[%s7713_s3 + $0xa60] ss:$8 sps:$4 sm:$0xff]  }
 0x285   :  { %3925 = vmatpush1.bf16.msra.mxu0 %v5386_v32  ;;  %v5466_v32 = vld [vmem:[%s7713_s3 + $0xa74] ss:$8 sps:$4 sm:$0xff]  }
 0x286   :  { %3926 = vmatprep.subr.bf16.mxu0 %v5394_v59  ;;  %v5464_v59 = vld [vmem:[%s7713_s3 + $0xa70] ss:$8 sps:$4 sm:$0xff]  }
 0x287   :  { %3730 = vmatpush1.bf16.msra.mxu1 %v5389_v5  ;;  %v5469_v5 = vld [vmem:[%s7713_s3 + $0xa84] ss:$8 sps:$4 sm:$0xff]  }
 0x288   :  { %3731 = vmatprep.subr.bf16.mxu1 %v5397_v60  ;;  %v5467_v60 = vld [vmem:[%s7713_s3 + $0xa80] ss:$8 sps:$4 sm:$0xff]  }
 0x289   :  { %3927 = vmatpush1.bf16.msra.mxu0 %v5392_v20  ;;  %v5472_v20 = vld [vmem:[%s7713_s3 + $0xa94] ss:$8 sps:$4 sm:$0xff]  }
 0x28a   :  { %3928 = vmatprep.subr.bf16.mxu0 %v5400_v21  ;;  %v5470_v21 = vld [vmem:[%s7713_s3 + $0xa90] ss:$8 sps:$4 sm:$0xff]  }
 0x28b   :  { %3732 = vmatpush1.bf16.msra.mxu1 %v5395_v4  ;;  %v5475_v4 = vld [vmem:[%s7713_s3 + $0xaa4] ss:$8 sps:$4 sm:$0xff]  }
 0x28c   :  { %3733 = vmatprep.subr.bf16.mxu1 %v5403_v3  ;;  %v5473_v3 = vld [vmem:[%s7713_s3 + $0xaa0] ss:$8 sps:$4 sm:$0xff]  }
 0x28d   :  { %3929 = vmatpush1.bf16.msra.mxu0 %v5398_v61  ;;  %v5478_v61 = vld [vmem:[%s7713_s3 + $0xab4] ss:$8 sps:$4 sm:$0xff]  }
 0x28e   :  { %3930 = vmatprep.subr.bf16.mxu0 %v5406_v30  ;;  %v5476_v30 = vld [vmem:[%s7713_s3 + $0xab0] ss:$8 sps:$4 sm:$0xff]  }
 0x28f   :  { %3734 = vmatpush1.bf16.msra.mxu1 %v5401_v33  ;;  %v5481_v33 = vld [vmem:[%s7713_s3 + $0xac4] ss:$8 sps:$4 sm:$0xff]  }
 0x290   :  { %3735 = vmatprep.subr.bf16.mxu1 %v5409_v8  ;;  %v5479_v8 = vld [vmem:[%s7713_s3 + $0xac0] ss:$8 sps:$4 sm:$0xff]  }
 0x291   :  { %3931 = vmatpush1.bf16.msra.mxu0 %v5404_v23  ;;  %v5484_v23 = vld [vmem:[%s7713_s3 + $0xad4] ss:$8 sps:$4 sm:$0xff]  }
 0x292   :  { %3932 = vmatprep.subr.bf16.mxu0 %v5412_v42  ;;  %v5482_v42 = vld [vmem:[%s7713_s3 + $0xad0] ss:$8 sps:$4 sm:$0xff]  }
 0x293   :  { %3736 = vmatpush1.bf16.msra.mxu1 %v5407_v25  ;;  %v5487_v25 = vld [vmem:[%s7713_s3 + $0xae4] ss:$8 sps:$4 sm:$0xff]  }
 0x294   :  { %3737 = vmatprep.subr.bf16.mxu1 %v5415_v18  ;;  %v5485_v18 = vld [vmem:[%s7713_s3 + $0xae0] ss:$8 sps:$4 sm:$0xff]  }
 0x295   :  { %3933 = vmatpush1.bf16.msra.mxu0 %v5410_v28  ;;  %v5490_v28 = vld [vmem:[%s7713_s3 + $0xaf4] ss:$8 sps:$4 sm:$0xff]  }
 0x296   :  { %3934 = vmatprep.subr.bf16.mxu0 %v5418_v15  ;;  %v5488_v15 = vld [vmem:[%s7713_s3 + $0xaf0] ss:$8 sps:$4 sm:$0xff]  }
 0x297   :  { %3738 = vmatpush1.bf16.msra.mxu1 %v5413_v6  ;;  %v811_v6 = vmax.f32 %v6512_v7, 0.0  ;;  %v5494_v7 = vld [vmem:[%s7713_s3 + $0xb10] ss:$8 sps:$4 sm:$0xff]  }
 0x298   :  { %3739 = vmatprep.subr.bf16.mxu1 %v5421_v2  ;;  %v5493_v2 = vld [vmem:[%s7713_s3 + $0xb04] ss:$8 sps:$4 sm:$0xff]  }
 0x299   :  { %3935 = vmatpush1.bf16.msra.mxu0 %v5416_v1  ;;  %v814_v1 = vmax.f32 %v6536_v56, 0.0  ;;  %v5499_v56 = vld [vmem:[%s7713_s3 + $0xb24] ss:$8 sps:$4 sm:$0xff]  }
 0x29a   :  { %3936 = vmatprep.subr.bf16.mxu0 %v5424_v40  ;;  %v5491_v40 = vld [vmem:[%s7713_s3 + $0xb00] ss:$8 sps:$4 sm:$0xff]  }
 0x29b   :  { %3740 = vmatpush1.bf16.msra.mxu1 %v5419_v45  ;;  %v839_v45 = vpack.c.bf16 %v811_v6, %v811_v6  ;;  %v5644_v6 = vld [vmem:[%s7715_s5 + $0x20] sm:$0xff]  }
 0x29c   :  { %3741 = vmatprep.subr.bf16.mxu1 %v5427_v49  ;;  %v5496_v49 = vld [vmem:[%s7713_s3 + $0xb14] ss:$8 sps:$4 sm:$0xff]  }
 0x29d   :  { %3937 = vmatpush1.bf16.msra.mxu0 %v5422_v10  ;;  %v842_v10 = vpack.c.bf16 %v814_v1, %v814_v1  ;;  %v5645_v1 = vld [vmem:[%s7715_s5 + $0x68] sm:$0xff]  }
 0x29e   :  { %3938 = vmatprep.subr.bf16.mxu0 %v5430_v50  ;;  %v5497_v50 = vld [vmem:[%s7713_s3 + $0xb20] ss:$8 sps:$4 sm:$0xff]  }
 0x29f   :  { %3742 = vmatpush1.bf16.msra.mxu1 %v5425_v52  ;;  %v5502_v52 = vld [vmem:[%s7713_s3 + $0xb34] ss:$8 sps:$4 sm:$0xff]  }
 0x2a1   :  { %3939 = vmatpush1.bf16.msra.mxu0 %v5428_v39  ;;  %v5505_v39 = vld [vmem:[%s7713_s3 + $0xb44] ss:$8 sps:$4 sm:$0xff]  }
 0x2a2   :  { %3744 = vmatmul.mubr.bf16.vlgmr.msra.gmra.mrb[112].mxu1 %v827_v16  ;;  %3940 = vmatprep.subr.bf16.mxu0 %v5433_v0  ;;  %v5503_v0 = vld [vmem:[%s7713_s3 + $0xb40] ss:$8 sps:$4 sm:$0xff]   ;;  %v5508_v16 = vld [vmem:[%s7713_s3 + $0xb54] ss:$8 sps:$4 sm:$0xff]  }
 0x2a5   :  { %3941 = vmatpush1.bf16.msra.mxu0 %v5431_v44  ;;  %v5506_v44 = vld [vmem:[%s7713_s3 + $0xb50] ss:$8 sps:$4 sm:$0xff]  }
 0x2a6   :  { %3942 = vmatprep.subr.bf16.mxu0 %v5436_v51  ;;  %v5511_v51 = vld [vmem:[%s7713_s3 + $0xb64] ss:$8 sps:$4 sm:$0xff]  }
 0x2a9   :  { %3943 = vmatpush1.bf16.msra.mxu0 %v5434_v31  ;;  %v5509_v31 = vld [vmem:[%s7713_s3 + $0xb60] ss:$8 sps:$4 sm:$0xff]  }
 0x2aa   :  { %3944 = vmatprep.subr.bf16.mxu0 %v5439_v17  ;;  %v5514_v17 = vld [vmem:[%s7713_s3 + $0xb74] ss:$8 sps:$4 sm:$0xff]  }
 0x2ad   :  { %3945 = vmatpush1.bf16.msra.mxu0 %v5437_v9  ;;  %v5512_v9 = vld [vmem:[%s7713_s3 + $0xb70] ss:$8 sps:$4 sm:$0xff]  }
 0x2ae   :  { %3946 = vmatprep.subr.bf16.mxu0 %v5442_v13  ;;  %v5517_v13 = vld [vmem:[%s7713_s3 + $0xb84] ss:$8 sps:$4 sm:$0xff]  }
 0x2b1   :  { %3947 = vmatpush1.bf16.msra.mxu0 %v5440_v34  ;;  %v5515_v34 = vld [vmem:[%s7713_s3 + $0xb80] ss:$8 sps:$4 sm:$0xff]  }
 0x2b2   :  { %3957 = vmatprep.subr.bf16.mxu0 %v5445_v55  ;;  %v5518_v55 = vld [vmem:[%s7713_s3 + $0xb90] ss:$8 sps:$4 sm:$0xff]  }
 0x2b4   :  { %3949 = vmatmul.mubr.bf16.vlgmr.msra.gmra.mrb[0].mxu0 %v837_v57  ;;  %v5526_v57 = vld [vmem:[%s7713_s3 + $0xbb4] ss:$8 sps:$4 sm:$0xff]  }
 0x2b5   :  { %3958 = vmatpush1.bf16.msra.mxu0 %v5443_v22  ;;  %3989 = vmatprep.mubr.bf16.mxu0 %v840_v24  ;;  %v5521_v22 = vld [vmem:[%s7713_s3 + $0xba0] ss:$8 sps:$4 sm:$0xff]   ;;  %v5529_v24 = vld [vmem:[%s7713_s3 + $0xbc4] ss:$8 sps:$4 sm:$0xff]  }
 0x2b6   :  { %3959 = vmatprep.subr.bf16.mxu0 %v5448_v63  ;;  %v5524_v63 = vld [vmem:[%s7713_s3 + $0xbb0] ss:$8 sps:$4 sm:$0xff]  }
 0x2b9   :  { %3960 = vmatpush1.bf16.msra.mxu0 %v5446_v43  ;;  %v5527_v43 = vld [vmem:[%s7713_s3 + $0xbc0] ss:$8 sps:$4 sm:$0xff]  }
 0x2ba   :  { %3961 = vmatprep.subr.bf16.mxu0 %v5451_v11  ;;  %v5532_v11 = vld [vmem:[%s7713_s3 + $0xbd4] ss:$8 sps:$4 sm:$0xff]  }
 0x2bd   :  { %3962 = vmatpush1.bf16.msra.mxu0 %v5449_v37  ;;  %v5530_v37 = vld [vmem:[%s7713_s3 + $0xbd0] ss:$8 sps:$4 sm:$0xff]  }
 0x2be   :  { %3963 = vmatprep.subr.bf16.mxu0 %v5454_v38  ;;  %v5535_v38 = vld [vmem:[%s7713_s3 + $0xbe4] ss:$8 sps:$4 sm:$0xff]  }
 0x2c1   :  { %3964 = vmatpush1.bf16.msra.mxu0 %v5452_v46  ;;  %v5533_v46 = vld [vmem:[%s7713_s3 + $0xbe0] ss:$8 sps:$4 sm:$0xff]  }
 0x2c2   :  { %3965 = vmatprep.subr.bf16.mxu0 %v5457_v36  ;;  %v5538_v36 = vld [vmem:[%s7713_s3 + $0xbf4] ss:$8 sps:$4 sm:$0xff]  }
 0x2c5   :  { %3966 = vmatpush1.bf16.msra.mxu0 %v5455_v58  ;;  %v5536_v58 = vld [vmem:[%s7713_s3 + $0xbf0] ss:$8 sps:$4 sm:$0xff]  }
 0x2c6   :  { %3967 = vmatprep.subr.bf16.mxu0 %v5460_v41  ;;  %v813_v41 = vmax.f32 %v6530_v47, 0.0  ;;  %v5542_v47 = vld [vmem:[%s7713_s3 + $0xc10] ss:$8 sps:$4 sm:$0xff]  }
 0x2c9   :  { %3968 = vmatpush1.bf16.msra.mxu0 %v5458_v27  ;;  %v5541_v27 = vld [vmem:[%s7713_s3 + $0xc04] ss:$8 sps:$4 sm:$0xff]  }
 0x2ca   :  { %3969 = vmatprep.subr.bf16.mxu0 %v5463_v26  ;;  %v816_v26 = vmax.f32 %v6573_v54, 0.0  ;;  %v5547_v54 = vld [vmem:[%s7713_s3 + $0xc24] ss:$8 sps:$4 sm:$0xff]  }
 0x2cd   :  { %3970 = vmatpush1.bf16.msra.mxu0 %v5461_v29  ;;  %v5539_v29 = vld [vmem:[%s7713_s3 + $0xc00] ss:$8 sps:$4 sm:$0xff]  }
 0x2ce   :  { %3971 = vmatprep.subr.bf16.mxu0 %v5466_v32  ;;  %v841_v32 = vpack.c.bf16 %v813_v41, %v813_v41  ;;  %v5598_v41 = vld [vmem:[%s7713_s3 + $0xd34] ss:$8 sps:$4 sm:$0xff]  }
 0x2d1   :  { %3972 = vmatpush1.bf16.msra.mxu0 %v5464_v59  ;;  %v5544_v59 = vld [vmem:[%s7713_s3 + $0xc14] ss:$8 sps:$4 sm:$0xff]  }
 0x2d2   :  { %3973 = vmatprep.subr.bf16.mxu0 %v5469_v5  ;;  %v844_v5 = vpack.c.bf16 %v816_v26, %v816_v26  ;;  %v5601_v26 = vld [vmem:[%s7713_s3 + $0xd44] ss:$8 sps:$4 sm:$0xff]  }
 0x2d5   :  { %3974 = vmatpush1.bf16.msra.mxu0 %v5467_v60  ;;  %v5635_v60 = vld [vmem:[%s7715_s5 + $0x40] sm:$0xff]  }
 0x2d6   :  { %3975 = vmatprep.subr.bf16.mxu0 %v5472_v20  ;;  %v5636_v20 = vld [vmem:[%s7715_s5] sm:$0xff]   ;;  %4838 = vmatprep.subr.bf16.mxu1 %v5635_v60  ;;  %v5608_v60 = vld [vmem:[%s7713_s3 + $0xd70] ss:$8 sps:$4 sm:$0xff]  }
 0x2d7   :  { %4839 = vmatpush3.bf16.msra.mxu1 %v5636_v20  ;;  %v5613_v20 = vld [vmem:[%s7713_s3 + $0xd84] ss:$8 sps:$4 sm:$0xff]  }
 0x2d9   :  { %3976 = vmatpush1.bf16.msra.mxu0 %v5470_v21  ;;  %v5545_v21 = vld [vmem:[%s7713_s3 + $0xc20] ss:$8 sps:$4 sm:$0xff]  }
 0x2da   :  { %3977 = vmatprep.subr.bf16.mxu0 %v5475_v4  ;;  %v5637_v4 = vld [vmem:[%s7715_s5 + $0x48] sm:$0xff]  }
 0x2db   :  { %4840 = vmatprep.subr.bf16.mxu1 %v5637_v4  ;;  %v5616_v4 = vld [vmem:[%s7713_s3 + $0xd94] ss:$8 sps:$4 sm:$0xff]  }
 0x2dd   :  { %3978 = vmatpush1.bf16.msra.mxu0 %v5473_v3  ;;  %v5638_v3 = vld [vmem:[%s7715_s5 + $0x8] sm:$0xff]  }
 0x2de   :  { %3979 = vmatprep.subr.bf16.mxu0 %v5478_v61  ;;  %v5639_v61 = vld [vmem:[%s7715_s5 + $0x50] sm:$0xff]   ;;  %4841 = vmatpush3.bf16.msra.mxu1 %v5638_v3 }
 0x2df   :  { %4842 = vmatprep.subr.bf16.mxu1 %v5639_v61  ;;  %v5614_v3 = vld [vmem:[%s7713_s3 + $0xd90] ss:$8 sps:$4 sm:$0xff]   ;;  %v5619_v61 = vld [vmem:[%s7713_s3 + $0xda4] ss:$8 sps:$4 sm:$0xff]  }
 0x2e1   :  { %3980 = vmatpush1.bf16.msra.mxu0 %v5476_v30  ;;  %v5550_v30 = vld [vmem:[%s7713_s3 + $0xc34] ss:$8 sps:$4 sm:$0xff]  }
 0x2e2   :  { %3981 = vmatprep.subr.bf16.mxu0 %v5481_v33  ;;  %v5548_v33 = vld [vmem:[%s7713_s3 + $0xc30] ss:$8 sps:$4 sm:$0xff]  }
 0x2e5   :  { %3982 = vmatpush1.bf16.msra.mxu0 %v5479_v8  ;;  %v5640_v8 = vld [vmem:[%s7715_s5 + $0x10] sm:$0xff]  }
 0x2e6   :  { %3983 = vmatprep.subr.bf16.mxu0 %v5484_v23  ;;  %v5641_v23 = vld [vmem:[%s7715_s5 + $0x58] sm:$0xff]   ;;  %4843 = vmatpush3.bf16.msra.mxu1 %v5640_v8 }
 0x2e7   :  { %4844 = vmatprep.subr.bf16.mxu1 %v5641_v23  ;;  %v5620_v8 = vld [vmem:[%s7713_s3 + $0xdb0] ss:$8 sps:$4 sm:$0xff]   ;;  %v5625_v23 = vld [vmem:[%s7713_s3 + $0xdc4] ss:$8 sps:$4 sm:$0xff]  }
 0x2e9   :  { %3984 = vmatpush1.bf16.msra.mxu0 %v5482_v42  ;;  %v5553_v42 = vld [vmem:[%s7713_s3 + $0xc44] ss:$8 sps:$4 sm:$0xff]  }
 0x2ea   :  { %3985 = vmatprep.subr.bf16.mxu0 %v5487_v25  ;;  %v5551_v25 = vld [vmem:[%s7713_s3 + $0xc40] ss:$8 sps:$4 sm:$0xff]  }
 0x2ed   :  { %3986 = vmatpush1.bf16.msra.mxu0 %v5485_v18  ;;  %v5642_v18 = vld [vmem:[%s7715_s5 + $0x18] sm:$0xff]  }
 0x2ee   :  { %3987 = vmatprep.subr.bf16.mxu0 %v5490_v28  ;;  %v5556_v28 = vld [vmem:[%s7713_s3 + $0xc54] ss:$8 sps:$4 sm:$0xff]   ;;  %4845 = vmatpush3.bf16.msra.mxu1 %v5642_v18  ;;  %v5626_v18 = vld [vmem:[%s7713_s3 + $0xdd0] ss:$8 sps:$4 sm:$0xff]  }
 0x2f1   :  { %3988 = vmatpush1.bf16.msra.mxu0 %v5488_v15  ;;  %v5643_v15 = vld [vmem:[%s7715_s5 + $0x60] sm:$0xff]  }
 0x2f2   :  { %3998 = vmatprep.subr.bf16.mxu0 %v5493_v2  ;;  %v5554_v2 = vld [vmem:[%s7713_s3 + $0xc50] ss:$8 sps:$4 sm:$0xff]   ;;  %4846 = vmatprep.subr.bf16.mxu1 %v5643_v15  ;;  %v5629_v15 = vld [vmem:[%s7713_s3 + $0xde0] ss:$8 sps:$4 sm:$0xff]  }
 0x2f3   :  { %4847 = vmatpush3.bf16.msra.mxu1 %v5644_v6  ;;  %v5634_v6 = vld [vmem:[%s7713_s3 + $0xdf4] ss:$8 sps:$4 sm:$0xff]  }
 0x2f4   :  { %3990 = vmatmul.mubr.bf16.vlgmr.msra.gmra.mrb[0].mxu0 %v839_v45  ;;  %v5646_v45 = vld [vmem:[%s7715_s5 + $0x28] sm:$0xff]   ;;  %4848 = vmatprep.subr.bf16.mxu1 %v5645_v1  ;;  %v817_v1 = vmax.f32 %v6582_v48, 0.0  ;;  %v5650_v48 = vld [vmem:[%s7715_s5 + $0x38] sm:$0xff]  }
 0x2f5   :  { %3999 = vmatpush1.bf16.msra.mxu0 %v5491_v40  ;;  %4030 = vmatprep.mubr.bf16.mxu0 %v842_v10  ;;  %v5559_v40 = vld [vmem:[%s7713_s3 + $0xc64] ss:$8 sps:$4 sm:$0xff]   ;;  %v5562_v10 = vld [vmem:[%s7713_s3 + $0xc74] ss:$8 sps:$4 sm:$0xff]  }
 0x2f6   :  { %4000 = vmatprep.subr.bf16.mxu0 %v5496_v49  ;;  %v5557_v49 = vld [vmem:[%s7713_s3 + $0xc60] ss:$8 sps:$4 sm:$0xff]  }
 0x2f7   :  { %4849 = vmatpush3.bf16.msra.mxu1 %v5646_v45  ;;  %v5647_v45 = vld [vmem:[%s7715_s5 + $0x70] sm:$0xff]  }
 0x2f8   :  { %4850 = vmatprep.subr.bf16.mxu1 %v5647_v45 }
 0x2f9   :  { %4001 = vmatpush1.bf16.msra.mxu0 %v5494_v7  ;;  %v5560_v7 = vld [vmem:[%s7713_s3 + $0xc70] ss:$8 sps:$4 sm:$0xff]  }
 0x2fa   :  { %4002 = vmatprep.subr.bf16.mxu0 %v5499_v56  ;;  %v5565_v56 = vld [vmem:[%s7713_s3 + $0xc84] ss:$8 sps:$4 sm:$0xff]  }
 0x2fd   :  { %4003 = vmatpush1.bf16.msra.mxu0 %v5497_v50  ;;  %v5563_v50 = vld [vmem:[%s7713_s3 + $0xc80] ss:$8 sps:$4 sm:$0xff]  }
 0x2fe   :  { %4004 = vmatprep.subr.bf16.mxu0 %v5502_v52  ;;  %v5568_v52 = vld [vmem:[%s7713_s3 + $0xc94] ss:$8 sps:$4 sm:$0xff]  }
 0x301   :  { %4005 = vmatpush1.bf16.msra.mxu0 %v5500_v12  ;;  %v5566_v12 = vld [vmem:[%s7713_s3 + $0xc90] ss:$8 sps:$4 sm:$0xff]  }
 0x302   :  { %4006 = vmatprep.subr.bf16.mxu0 %v5505_v39  ;;  %v5571_v39 = vld [vmem:[%s7713_s3 + $0xca4] ss:$8 sps:$4 sm:$0xff]  }
 0x305   :  { %4007 = vmatpush1.bf16.msra.mxu0 %v5503_v0  ;;  %v5569_v0 = vld [vmem:[%s7713_s3 + $0xca0] ss:$8 sps:$4 sm:$0xff]  }
 0x306   :  { %4008 = vmatprep.subr.bf16.mxu0 %v5508_v16  ;;  %v5574_v16 = vld [vmem:[%s7713_s3 + $0xcb4] ss:$8 sps:$4 sm:$0xff]  }
 0x309   :  { %4009 = vmatpush1.bf16.msra.mxu0 %v5506_v44  ;;  %v5572_v44 = vld [vmem:[%s7713_s3 + $0xcb0] ss:$8 sps:$4 sm:$0xff]  }
 0x30a   :  { %4010 = vmatprep.subr.bf16.mxu0 %v5511_v51  ;;  %v5577_v51 = vld [vmem:[%s7713_s3 + $0xcc4] ss:$8 sps:$4 sm:$0xff]  }
 0x30d   :  { %4011 = vmatpush1.bf16.msra.mxu0 %v5509_v31  ;;  %v5575_v31 = vld [vmem:[%s7713_s3 + $0xcc0] ss:$8 sps:$4 sm:$0xff]  }
 0x30e   :  { %4012 = vmatprep.subr.bf16.mxu0 %v5514_v17  ;;  %v5580_v17 = vld [vmem:[%s7713_s3 + $0xcd4] ss:$8 sps:$4 sm:$0xff]  }
 0x311   :  { %4013 = vmatpush1.bf16.msra.mxu0 %v5512_v9  ;;  %v5578_v9 = vld [vmem:[%s7713_s3 + $0xcd0] ss:$8 sps:$4 sm:$0xff]  }
 0x312   :  { %4014 = vmatprep.subr.bf16.mxu0 %v5517_v13  ;;  %v5583_v13 = vld [vmem:[%s7713_s3 + $0xce4] ss:$8 sps:$4 sm:$0xff]  }
 0x315   :  { %4015 = vmatpush1.bf16.msra.mxu0 %v5515_v34  ;;  %v5581_v34 = vld [vmem:[%s7713_s3 + $0xce0] ss:$8 sps:$4 sm:$0xff]  }
 0x316   :  { %4016 = vmatprep.subr.bf16.mxu0 %v5520_v62  ;;  %v5586_v62 = vld [vmem:[%s7713_s3 + $0xcf4] ss:$8 sps:$4 sm:$0xff]  }
 0x319   :  { %4017 = vmatpush1.bf16.msra.mxu0 %v5518_v55  ;;  %v5584_v55 = vld [vmem:[%s7713_s3 + $0xcf0] ss:$8 sps:$4 sm:$0xff]  }
 0x31a   :  { %4018 = vmatprep.subr.bf16.mxu0 %v5523_v19  ;;  %v815_v19 = vmax.f32 %v6564_v14, 0.0 }
 0x31d   :  { %4019 = vmatpush1.bf16.msra.mxu0 %v5521_v22  ;;  %v5589_v22 = vld [vmem:[%s7713_s3 + $0xd04] ss:$8 sps:$4 sm:$0xff]  }
 0x31e   :  { %4020 = vmatprep.subr.bf16.mxu0 %v5526_v57  ;;  %v818_v57 = vmax.f32 %v6588_v53, 0.0  ;;  %v5590_v53 = vld [vmem:[%s7713_s3 + $0xd10] ss:$8 sps:$4 sm:$0xff]  }
 0x321   :  { %4021 = vmatpush1.bf16.msra.mxu0 %v5524_v63  ;;  %v5587_v63 = vld [vmem:[%s7713_s3 + $0xd00] ss:$8 sps:$4 sm:$0xff]  }
 0x322   :  { %4022 = vmatprep.subr.bf16.mxu0 %v5529_v24  ;;  %v843_v24 = vpack.c.bf16 %v815_v19, %v815_v19 }
 0x325   :  { %4023 = vmatpush1.bf16.msra.mxu0 %v5527_v43  ;;  %v5592_v43 = vld [vmem:[%s7713_s3 + $0xd14] ss:$8 sps:$4 sm:$0xff]  }
 0x326   :  { %4024 = vmatprep.subr.bf16.mxu0 %v5532_v11  ;;  %v846_v11 = vpack.c.bf16 %v818_v57, %v818_v57 }
 0x329   :  { %4025 = vmatpush1.bf16.msra.mxu0 %v5530_v37 }
 0x32a   :  { %4026 = vmatprep.subr.bf16.mxu0 %v5535_v38  ;;  %v5595_v38 = vld [vmem:[%s7713_s3 + $0xd24] ss:$8 sps:$4 sm:$0xff]  }
 0x32d   :  { %4027 = vmatpush1.bf16.msra.mxu0 %v5533_v46 }
 0x32e   :  { %4028 = vmatprep.subr.bf16.mxu0 %v5538_v36 }
 0x331   :  { %4029 = vmatpush1.bf16.msra.mxu0 %v5536_v58  ;;  %v5593_v58 = vld [vmem:[%s7713_s3 + $0xd20] ss:$8 sps:$4 sm:$0xff]  }
 0x332   :  { %4039 = vmatprep.subr.bf16.mxu0 %v5541_v27  ;;  %v5596_v27 = vld [vmem:[%s7713_s3 + $0xd30] ss:$8 sps:$4 sm:$0xff]  }
 0x334   :  { %4031 = vmatmul.mubr.bf16.vlgmr.msra.gmra.mrb[0].mxu0 %v841_v32  ;;  %v5604_v32 = vld [vmem:[%s7713_s3 + $0xd54] ss:$8 sps:$4 sm:$0xff]  }
 0x335   :  { %4040 = vmatpush1.bf16.msra.mxu0 %v5539_v29  ;;  %4071 = vmatprep.mubr.bf16.mxu0 %v844_v5  ;;  %v5599_v29 = vld [vmem:[%s7713_s3 + $0xd40] ss:$8 sps:$4 sm:$0xff]   ;;  %v5607_v5 = vld [vmem:[%s7713_s3 + $0xd64] ss:$8 sps:$4 sm:$0xff]  }
 0x336   :  { %4041 = vmatprep.subr.bf16.mxu0 %v5544_v59  ;;  %v5602_v59 = vld [vmem:[%s7713_s3 + $0xd50] ss:$8 sps:$4 sm:$0xff]  }
 0x339   :  { %4042 = vmatpush1.bf16.msra.mxu0 %v5542_v47  ;;  %v5605_v47 = vld [vmem:[%s7713_s3 + $0xd60] ss:$8 sps:$4 sm:$0xff]  }
 0x33a   :  { %4043 = vmatprep.subr.bf16.mxu0 %v5547_v54  ;;  %v5610_v54 = vld [vmem:[%s7713_s3 + $0xd74] ss:$8 sps:$4 sm:$0xff]  }
 0x33d   :  { %4044 = vmatpush1.bf16.msra.mxu0 %v5545_v21  ;;  %v5611_v21 = vld [vmem:[%s7713_s3 + $0xd80] ss:$8 sps:$4 sm:$0xff]  }
 0x33e   :  { %4045 = vmatprep.subr.bf16.mxu0 %v5550_v30  ;;  %v5617_v30 = vld [vmem:[%s7713_s3 + $0xda0] ss:$8 sps:$4 sm:$0xff]  }
 0x341   :  { %4046 = vmatpush1.bf16.msra.mxu0 %v5548_v33  ;;  %v5622_v33 = vld [vmem:[%s7713_s3 + $0xdb4] ss:$8 sps:$4 sm:$0xff]  }
 0x342   :  { %4047 = vmatprep.subr.bf16.mxu0 %v5553_v42  ;;  %v5623_v42 = vld [vmem:[%s7713_s3 + $0xdc0] ss:$8 sps:$4 sm:$0xff]  }
 0x345   :  { %4048 = vmatpush1.bf16.msra.mxu0 %v5551_v25  ;;  %v5628_v25 = vld [vmem:[%s7713_s3 + $0xdd4] ss:$8 sps:$4 sm:$0xff]  }
 0x346   :  { %4049 = vmatprep.subr.bf16.mxu0 %v5556_v28  ;;  %v5631_v28 = vld [vmem:[%s7713_s3 + $0xde4] ss:$8 sps:$4 sm:$0xff]  }
 0x349   :  { %4050 = vmatpush1.bf16.msra.mxu0 %v5554_v2  ;;  %v5632_v2 = vld [vmem:[%s7713_s3 + $0xdf0] ss:$8 sps:$4 sm:$0xff]  }
 0x34a   :  { %4051 = vmatprep.subr.bf16.mxu0 %v5559_v40  ;;  %v845_v40 = vpack.c.bf16 %v817_v1, %v817_v1 }
 0x34d   :  { %4052 = vmatpush1.bf16.msra.mxu0 %v5557_v49  ;;  %v5648_v49 = vld [vmem:[%s7715_s5 + $0x30] sm:$0xff]  }
 0x34e   :  { %4053 = vmatprep.subr.bf16.mxu0 %v5562_v10  ;;  %4851 = vmatpush3.bf16.msra.mxu1 %v5648_v49  ;;  %v5649_v10 = vld [vmem:[%s7715_s5 + $0x78] sm:$0xff]  }
 0x34f   :  { %4852 = vmatprep.subr.bf16.mxu1 %v5649_v10 }
 0x351   :  { %4054 = vmatpush1.bf16.msra.mxu0 %v5560_v7  ;;  %v1295_v7 = vld [vmem:[%s7716_s4] sm:$0x3] }
 0x352   :  { %4055 = vmatprep.subr.bf16.mxu0 %v5565_v56  ;;  %4853 = vmatpush3.bf16.msra.mxu1 %v5650_v48  ;;  %v7845_v56 = vsub.s32 0, %v6278_v35 }
 0x355   :  { %4056 = vmatpush1.bf16.msra.mxu0 %v5563_v50  ;;  %v1300_v50 = vrot.slane %v1295_v7, %v7845_v56 }
 0x356   :  { %4057 = vmatprep.subr.bf16.mxu0 %v5568_v52  ;;  %v7846_v52 = vsub.s32 1, %v6278_v35  ;;  %v4821_v35 = vld [vmem:[%s7717_s6] ss:$0 sm:$0xff] }
 0x359   :  { %4058 = vmatpush1.bf16.msra.mxu0 %v5566_v12  ;;  %v1304_v12 = vrot.slane %v1295_v7, %v7846_v52 }
 0x35a   :  { %4059 = vmatprep.subr.bf16.mxu0 %v5571_v39 }
 0x35d   :  { %4060 = vmatpush1.bf16.msra.mxu0 %v5569_v0 }
 0x35e   :  { %4061 = vmatprep.subr.bf16.mxu0 %v5574_v16 }
 0x361   :  { %4062 = vmatpush1.bf16.msra.mxu0 %v5572_v44 }
 0x362   :  { %4063 = vmatprep.subr.bf16.mxu0 %v5577_v51 }
 0x365   :  { %4064 = vmatpush1.bf16.msra.mxu0 %v5575_v31 }
 0x366   :  { %4065 = vmatprep.subr.bf16.mxu0 %v5580_v17 }
 0x369   :  { %4066 = vmatpush1.bf16.msra.mxu0 %v5578_v9 }
 0x36a   :  { %4067 = vmatprep.subr.bf16.mxu0 %v5583_v13 }
 0x36d   :  { %4068 = vmatpush1.bf16.msra.mxu0 %v5581_v34 }
 0x36e   :  { %4069 = vmatprep.subr.bf16.mxu0 %v5586_v62 }
 0x371   :  { %4070 = vmatpush1.bf16.msra.mxu0 %v5584_v55 }
 0x372   :  { %4080 = vmatprep.subr.bf16.mxu0 %v5589_v22 }
 0x374   :  { %4072 = vmatmul.mubr.bf16.vlgmr.msra.gmra.mrb[0].mxu0 %v843_v24 }
 0x375   :  { %v7592_v14 = vpop.f32.mrb[112].mxu1  ;;  %4081 = vmatpush1.bf16.msra.mxu0 %v5587_v63  ;;  %4112 = vmatprep.mubr.bf16.mxu0 %v846_v11 }
 0x376   :  { %v7597_v37 = vpop.f32.mrb[113].mxu1  ;;  %4082 = vmatprep.subr.bf16.mxu0 %v5592_v43  ;;  %v4860_v39 = vadd.f32 %v7592_v14, %v1300_v50 }
 0x377   :  { %v3749_v46 = vpop.f32.mrb[114].mxu1  ;;  %v4862_v0 = vadd.f32 %v7597_v37, %v1304_v12 }
 0x378   :  { %v3750_v36 = vpop.f32.mrb[115].mxu1 }
 0x379   :  { %4083 = vmatpush1.bf16.msra.mxu0 %v5590_v53 }
 0x37a   :  { %4084 = vmatprep.subr.bf16.mxu0 %v5595_v38 }
 0x37d   :  { %4085 = vmatpush1.bf16.msra.mxu0 %v5593_v58 }
 0x37e   :  { %4086 = vmatprep.subr.bf16.mxu0 %v5598_v41 }
 0x381   :  { %4087 = vmatpush1.bf16.msra.mxu0 %v5596_v27 }
 0x382   :  { %4088 = vmatprep.subr.bf16.mxu0 %v5601_v26 }
 0x385   :  { %4089 = vmatpush1.bf16.msra.mxu0 %v5599_v29 }
 0x386   :  { %4090 = vmatprep.subr.bf16.mxu0 %v5604_v32 }
 0x389   :  { %4091 = vmatpush1.bf16.msra.mxu0 %v5602_v59 }
 0x38a   :  { %4092 = vmatprep.subr.bf16.mxu0 %v5607_v5 }
 0x38d   :  { %4093 = vmatpush1.bf16.msra.mxu0 %v5605_v47 }
 0x38e   :  { %4094 = vmatprep.subr.bf16.mxu0 %v5610_v54 }
 0x391   :  { %4095 = vmatpush1.bf16.msra.mxu0 %v5608_v60 }
 0x392   :  { %4096 = vmatprep.subr.bf16.mxu0 %v5613_v20 }
 0x395   :  { %4097 = vmatpush1.bf16.msra.mxu0 %v5611_v21 }
 0x396   :  { %4098 = vmatprep.subr.bf16.mxu0 %v5616_v4 }
 0x399   :  { %4099 = vmatpush1.bf16.msra.mxu0 %v5614_v3 }
 0x39a   :  { %4100 = vmatprep.subr.bf16.mxu0 %v5619_v61 }
 0x39d   :  { %4101 = vmatpush1.bf16.msra.mxu0 %v5617_v30 }
 0x39e   :  { %4102 = vmatprep.subr.bf16.mxu0 %v5622_v33 }
 0x3a1   :  { %4103 = vmatpush1.bf16.msra.mxu0 %v5620_v8 }
 0x3a2   :  { %4104 = vmatprep.subr.bf16.mxu0 %v5625_v23 }
 0x3a5   :  { %4105 = vmatpush1.bf16.msra.mxu0 %v5623_v42 }
 0x3a6   :  { %4106 = vmatprep.subr.bf16.mxu0 %v5628_v25 }
 0x3a9   :  { %4107 = vmatpush1.bf16.msra.mxu0 %v5626_v18 }
 0x3aa   :  { %4108 = vmatprep.subr.bf16.mxu0 %v5631_v28 }
 0x3ad   :  { %4109 = vmatpush1.bf16.msra.mxu0 %v5629_v15 }
 0x3ae   :  { %4110 = vmatprep.subr.bf16.mxu0 %v5634_v6 }
 0x3b1   :  { %4111 = vmatpush1.bf16.msra.mxu0 %v5632_v2 }
 0x3b4   :  { %4113 = vmatmul.mubr.bf16.vlgmr.msra.gmra.mrb[0].mxu0 %v845_v40 }
 0x487   :  { %v4114_v16 = vpop.f32.mrb[0].mxu0 }
 0x488   :  { %v4861_v44 = vadd.f32 %v4860_v39, %v4114_v16  ;;  %v4116_v51 = vpop.f32.mrb[1].mxu0 }
 0x489   :  { %v4863_v31 = vadd.f32 %v4862_v0, %v4116_v51  ;;  %v4118_v17 = vpop.f32.mrb[2].mxu0 }
 0x48a   :  { %v4121_v9 = vmax.f32 %v4861_v44, 0.0  ;;  %v4119_v13 = vpop.f32.mrb[3].mxu0 }
 0x48b   :  { %v4122_v34 = vmax.f32 %v4863_v31, 0.0 }
 0x48c   :  { %v4123_v55 = vpack.c.bf16 %v4121_v9, %v4121_v9 }
 0x48d   :  { %v4124_v62 = vpack.c.bf16 %v4122_v34, %v4122_v34 }
 0x48f   :  { %4292 = vmatprep.mubr.bf16.mxu1 %v4124_v62 }
 0x490   :  { %4293 = vmatmul.mubr.bf16.vlgmr.msra.gmra.mrb[116].mxu1 %v4123_v55 }
 0x563   :  { %v4854_v19 = vpop.f32.mrb[116].mxu1 }
 0x564   :  { %v4855_v22 = vpop.f32.mrb[117].mxu1 }
 0x565   :  { %v4856_v57 = vadd.f32 %v4855_v22, %v4854_v19  ;;  %v4857_v63 = vpop.f32.mrb[118].mxu1 }
 0x566   :  { %v4858_v24 = vpop.f32.mrb[119].mxu1 }
 0x567   :  { %v4295_v43 = vadd.f32 %v4856_v57, %v4821_v35 }
 0x569   :  { %4300 = vst [vmem:[%s7718_s7] sm:$0xff] %v4295_v43 }

</bundles_post_ra>
